<compile_context>
chip_gen: v7x
topology: tpu7x:2x2x1
jax: 0.10.0
libtpu: 0.0.40
codegen_flags: <defaults>
</compile_context>

<pallas_src>
import functools

import jax
import jax.numpy as jnp
from jax.experimental import pallas as pl
from jax.experimental.pallas import tpu as pltpu

_LANE = 128  # lane-dense output width for all matmul kernels


def _round_up(x, m):
    return (x + m - 1) // m * m


# -----------------------------------------------------------------------------
# Pallas kernels
# -----------------------------------------------------------------------------
def _conv_mm_kernel(p_ref, w_ref, b_ref, o_ref, acc_ref, *, alpha, k_tiles):
    """One (tm, 128) tile of LeakyReLU(patches @ W + b).

    Grid = (M_tiles, K_tiles); K (reduction) is the last grid axis.
    bf16 inputs on the MXU, f32 accumulation, f32 epilogue.
    """
    k = pl.program_id(1)

    @pl.when(k == 0)
    def _():
        acc_ref[...] = jnp.zeros_like(acc_ref)

    acc_ref[...] += jnp.dot(p_ref[...], w_ref[...],
                            preferred_element_type=jnp.float32)

    @pl.when(k == k_tiles - 1)
    def _():
        out = acc_ref[...] + b_ref[...]
        if alpha is not None:
            out = jnp.where(out >= 0.0, out, jnp.float32(alpha) * out)
        o_ref[...] = out.astype(o_ref.dtype)


def _final_hinge_kernel(p_ref, w_ref, b_ref, rsum_ref, fsum_ref,
                        acc_ref, sums_ref, *, k_tiles, m_tiles, tm,
                        m_half, m_valid):
    """Fused final 1-channel conv + hinge reductions.

    logits = patches @ w + b live only in VMEM scratch (lane 0 of a 128-wide
    tile, never stored to HBM).  Hinge partial sums accumulate in SMEM scratch:
        rsum = sum(relu(1 - logits[real rows]))   rows [0, m_half)
        fsum = sum(relu(1 + logits[fake rows]))   rows [m_half, m_valid)
    Written out once at the last grid step.
    """
    i = pl.program_id(0)
    k = pl.program_id(1)

    @pl.when(jnp.logical_and(i == 0, k == 0))
    def _():
        sums_ref[0] = jnp.float32(0.0)
        sums_ref[1] = jnp.float32(0.0)

    @pl.when(k == 0)
    def _():
        acc_ref[...] = jnp.zeros_like(acc_ref)

    acc_ref[...] += jnp.dot(p_ref[...], w_ref[...],
                            preferred_element_type=jnp.float32)

    @pl.when(k == k_tiles - 1)
    def _():
        logits = acc_ref[...] + b_ref[...]            # (tm, 128); lane 0 = logit
        row = jax.lax.broadcasted_iota(jnp.int32, logits.shape, 0) + i * tm
        col = jax.lax.broadcasted_iota(jnp.int32, logits.shape, 1)
        lane0 = col == 0
        real_m = jnp.logical_and(lane0, row < m_half)
        fake_m = jnp.logical_and(
            lane0, jnp.logical_and(row >= m_half, row < m_valid))
        sums_ref[0] += jnp.sum(
            jnp.where(real_m, jnp.maximum(1.0 - logits, 0.0), 0.0))
        sums_ref[1] += jnp.sum(
            jnp.where(fake_m, jnp.maximum(1.0 + logits, 0.0), 0.0))

    @pl.when(jnp.logical_and(i == m_tiles - 1, k == k_tiles - 1))
    def _():
        rsum_ref[0, 0] = sums_ref[0]
        fsum_ref[0, 0] = sums_ref[1]


def _fm_l1_kernel(r_ref, f_ref, w_ref, o_ref, acc_ref):
    """o = sum(w * |r - f|); w encodes per-feature 1/n (padding has w = 0)."""
    i = pl.program_id(0)

    @pl.when(i == 0)
    def _():
        acc_ref[0] = jnp.float32(0.0)

    acc_ref[0] += jnp.sum(w_ref[...] * jnp.abs(r_ref[...] - f_ref[...]))

    @pl.when(i == pl.num_programs(0) - 1)
    def _():
        o_ref[0, 0] = acc_ref[0]


# -----------------------------------------------------------------------------
# Pallas wrappers
# -----------------------------------------------------------------------------
def _pick_tk(Kp):
    """Largest multiple of 128 (<= 512) that divides Kp."""
    for cand in (512, 384, 256, 128):
        if Kp % cand == 0:
            return cand
    return 128


def _pad_operands(patches, w, b):
    """Pad M to a sublane-multiple tile, K to 128-multiples, cout to 128 lanes.

    Patches/weights are cast to bf16 (halves HBM bytes, native MXU path);
    bias stays f32 for the epilogue.  Zero padding keeps the math exact and
    LeakyReLU(0) == 0, so padded output columns/rows are exactly zero.
    """
    M, K = patches.shape
    cout = w.shape[1]
    Kp = _round_up(K, 128)
    tk = _pick_tk(Kp)
    Mp8 = _round_up(M, 8)
    tm = min(128, Mp8)
    Mp = _round_up(M, tm)
    p = jnp.pad(patches, ((0, Mp - M), (0, Kp - K))).astype(jnp.bfloat16)
    wp = jnp.pad(w, ((0, Kp - K), (0, _LANE - cout))).astype(jnp.bfloat16)
    bp = jnp.pad(b, (0, _LANE - cout)).astype(jnp.float32).reshape(1, _LANE)
    return p, wp, bp, tm, tk, Mp, Kp


def _matmul_compiler_params(tm, tk, semantics):
    # double-buffered bf16 inputs + double-buffered f32 output + f32 accumulator
    need = (2 * (tm * tk * 2 + tk * _LANE * 2 + _LANE * 4)
            + 2 * tm * _LANE * 4 + tm * _LANE * 4)
    vmem = min(max(4 * need, 16 << 20), 32 << 20)   # fits all of v5e/v6e/v7x
    return pltpu.CompilerParams(dimension_semantics=semantics,
                                vmem_limit_bytes=vmem)


def pallas_conv_matmul(patches, w, b, alpha):
    """(M, K) f32 patches -> LeakyReLU(patches @ w + b) as (M, cout) f32."""
    M, K = patches.shape
    cout = w.shape[1]
    p, wp, bp, tm, tk, Mp, Kp = _pad_operands(patches, w, b)
    m_tiles, k_tiles = Mp // tm, Kp // tk

    cost = pl.CostEstimate(
        flops=2 * Mp * Kp * _LANE, transcendentals=0,
        bytes_accessed=p.size * 2 + wp.size * 2 + bp.size * 4 + Mp * _LANE * 4)

    out = pl.pallas_call(
        functools.partial(_conv_mm_kernel, alpha=alpha, k_tiles=k_tiles),
        out_shape=jax.ShapeDtypeStruct((Mp, _LANE), jnp.float32),
        grid=(m_tiles, k_tiles),
        in_specs=[
            pl.BlockSpec((tm, tk), lambda i, k: (i, k)),
            pl.BlockSpec((tk, _LANE), lambda i, k: (k, 0)),
            pl.BlockSpec((1, _LANE), lambda i, k: (0, 0)),
        ],
        out_specs=pl.BlockSpec((tm, _LANE), lambda i, k: (i, 0)),
        scratch_shapes=[pltpu.VMEM((tm, _LANE), jnp.float32)],
        compiler_params=_matmul_compiler_params(
            tm, tk, ("parallel", "arbitrary")),
        cost_estimate=cost,
    )(p, wp, bp)
    return out[:M, :cout]


def pallas_final_hinge(patches, w, b):
    """Fused final conv (cout=1) + hinge sums -> (rsum, fsum) scalars."""
    M, K = patches.shape
    p, wp, bp, tm, tk, Mp, Kp = _pad_operands(patches, w, b)
    m_tiles, k_tiles = Mp // tm, Kp // tk
    m_half = M // 2

    cost = pl.CostEstimate(
        flops=2 * Mp * Kp * _LANE, transcendentals=0,
        bytes_accessed=p.size * 2 + wp.size * 2 + bp.size * 4)

    rsum, fsum = pl.pallas_call(
        functools.partial(_final_hinge_kernel, k_tiles=k_tiles,
                          m_tiles=m_tiles, tm=tm, m_half=m_half, m_valid=M),
        out_shape=(jax.ShapeDtypeStruct((1, 1), jnp.float32),
                   jax.ShapeDtypeStruct((1, 1), jnp.float32)),
        grid=(m_tiles, k_tiles),
        in_specs=[
            pl.BlockSpec((tm, tk), lambda i, k: (i, k)),
            pl.BlockSpec((tk, _LANE), lambda i, k: (k, 0)),
            pl.BlockSpec((1, _LANE), lambda i, k: (0, 0)),
        ],
        out_specs=(
            pl.BlockSpec((1, 1), lambda i, k: (0, 0),
                         memory_space=pltpu.MemorySpace.SMEM),
            pl.BlockSpec((1, 1), lambda i, k: (0, 0),
                         memory_space=pltpu.MemorySpace.SMEM),
        ),
        scratch_shapes=[pltpu.VMEM((tm, _LANE), jnp.float32),
                        pltpu.SMEM((2,), jnp.float32)],
        compiler_params=_matmul_compiler_params(
            tm, tk, ("arbitrary", "arbitrary")),
        cost_estimate=cost,
    )(p, wp, bp)
    return rsum[0, 0], fsum[0, 0]


def pallas_feature_matching(real_feats, fake_feats):
    """sum_i mean(|real_i - fake_i|) as ONE lane-dense weighted-L1 reduction."""
    rs, fs, ws = [], [], []
    for rf, ff in zip(real_feats, fake_feats):
        n = rf.size
        rs.append(rf.reshape(-1))
        fs.append(ff.reshape(-1))
        ws.append(jnp.full((n,), 1.0 / n, jnp.float32))   # per-feature 1/n
    r = jnp.concatenate(rs)
    f = jnp.concatenate(fs)
    w = jnp.concatenate(ws)

    total = r.shape[0]
    rows = _round_up(pl.cdiv(total, _LANE), 8)
    tr = rows if rows <= 512 else 512
    rows = _round_up(rows, tr)
    pad = rows * _LANE - total
    r = jnp.pad(r, (0, pad)).reshape(rows, _LANE)
    f = jnp.pad(f, (0, pad)).reshape(rows, _LANE)
    w = jnp.pad(w, (0, pad)).reshape(rows, _LANE)        # padded weights are 0
    r_tiles = rows // tr

    out = pl.pallas_call(
        _fm_l1_kernel,
        out_shape=jax.ShapeDtypeStruct((1, 1), jnp.float32),
        grid=(r_tiles,),
        in_specs=[
            pl.BlockSpec((tr, _LANE), lambda i: (i, 0)),
            pl.BlockSpec((tr, _LANE), lambda i: (i, 0)),
            pl.BlockSpec((tr, _LANE), lambda i: (i, 0)),
        ],
        out_specs=pl.BlockSpec((1, 1), lambda i: (0, 0),
                               memory_space=pltpu.MemorySpace.SMEM),
        scratch_shapes=[pltpu.SMEM((1,), jnp.float32)],
        compiler_params=pltpu.CompilerParams(
            dimension_semantics=("arbitrary",)),
    )(r, f, w)
    return out[0, 0]


# -----------------------------------------------------------------------------
# Discriminator glue (im2col / pooling in plain JAX, hot paths in Pallas)
# -----------------------------------------------------------------------------
def _im2col(x_nhwc, k, stride, pad):
    """x: (N,H,W,C) -> patches (N*Ho*Wo, k*k*C), plus (N, Ho, Wo)."""
    xp = jnp.pad(x_nhwc, ((0, 0), (pad, pad), (pad, pad), (0, 0)))
    N, H, W, C = xp.shape
    Ho = (H - k) // stride + 1
    Wo = (W - k) // stride + 1
    cols = []
    for di in range(k):
        for dj in range(k):
            cols.append(xp[:, di:di + stride * Ho:stride,
                           dj:dj + stride * Wo:stride, :])   # (N,Ho,Wo,C)
    patches = jnp.concatenate(cols, axis=-1)                  # (N,Ho,Wo,k*k*C)
    return patches.reshape(N * Ho * Wo, k * k * C), (N, Ho, Wo)


# (kernel, in_c, out_c, stride, pad, leaky_relu_alpha)
_LAYER_CFG = [
    (4, 3, 8, 2, 1, 0.2),
    (4, 8, 16, 2, 1, 0.2),
    (4, 16, 32, 2, 1, 0.2),
    (3, 32, 1, 1, 1, None),   # final prediction conv, no activation
]
_NUM_SCALES = 2


def init_discriminator_params(key):
    params = []
    for _ in range(_NUM_SCALES):
        scale_params = []
        for (k, cin, cout, _, _, _) in _LAYER_CFG:
            key, wk = jax.random.split(key)
            w = jax.random.normal(wk, (k, k, cin, cout), jnp.float32) * 0.02
            b = jnp.zeros((cout,), jnp.float32)
            # matmul form (k*k*cin, cout); ordering matches _im2col
            scale_params.append((w.reshape(k * k * cin, cout), b))
        params.append(scale_params)
    return params


def _avg_pool_2x2(x_nhwc):
    N, H, W, C = x_nhwc.shape
    return x_nhwc.reshape(N, H // 2, 2, W // 2, 2, C).mean(axis=(2, 4))


# -----------------------------------------------------------------------------
# GANLoss forward
# -----------------------------------------------------------------------------
def gan_loss_forward(params, config, real, fake):
    real_w = config["weights"]["gan"]["real"]
    fake_w = config["weights"]["gan"]["fake"]
    fm_w = config["weights"]["gan"]["feature_matching"]

    # Stack real & fake along batch -> discriminator runs once per scale.
    # Rows [0, M/2) of every im2col/matmul belong to `real`, the rest to `fake`.
    x = jnp.concatenate([real, fake], axis=0)
    x = jnp.transpose(x, (0, 2, 3, 1)).astype(jnp.float32)   # NCHW -> NHWC

    real_loss = jnp.float32(0.0)
    fake_loss = jnp.float32(0.0)
    real_feats, fake_feats = [], []

    cur = x
    for s in range(_NUM_SCALES):
        feat = cur
        # intermediate conv layers (these are the feature-matching features)
        for (k, _, cout, stride, pad, alpha), (w, b) in zip(
                _LAYER_CFG[:-1], params[s][:-1]):
            patches, (nb, ho, wo) = _im2col(feat, k, stride, pad)
            out2d = pallas_conv_matmul(patches, w, b, alpha)   # (M, cout) f32
            m_half = out2d.shape[0] // 2
            real_feats.append(out2d[:m_half])
            fake_feats.append(out2d[m_half:])
            feat = out2d.reshape(nb, ho, wo, cout)
        # final cout=1 conv, fused with the hinge reduction (no HBM logits)
        k, _, _, stride, pad, _ = _LAYER_CFG[-1]
        w, b = params[s][-1]
        patches, (nb, ho, wo) = _im2col(feat, k, stride, pad)
        rsum, fsum = pallas_final_hinge(patches, w, b)
        count = (nb // 2) * ho * wo          # elements of one hinge mean
        real_loss = real_loss + rsum / count
        fake_loss = fake_loss + fsum / count
        if s + 1 < _NUM_SCALES:
            cur = _avg_pool_2x2(cur)

    real_loss = real_loss * real_w
    fake_loss = fake_loss * fake_w

    # .detach() in the reference only affects gradients; forward value identical.
    feature_matching_loss = pallas_feature_matching(
        [jax.lax.stop_gradient(r) for r in real_feats], fake_feats) * fm_w

    n_outputs = _NUM_SCALES
    n_feats = len(real_feats)
    total_loss = ((real_loss + fake_loss) / n_outputs
                  + feature_matching_loss / n_feats)
    return total_loss, {
        "real_loss": real_loss,
        "fake_loss": fake_loss,
        "feature_matching_loss": feature_matching_loss,
    }


# -----------------------------------------------------------------------------
# main
# -----------------------------------------------------------------------------
if __name__ == "__main__":
    config = {"weights": {"gan": {"real": 1.0, "fake": 1.0,
                                  "feature_matching": 10.0}}}

    key = jax.random.PRNGKey(0)
    kp, kr, kf = jax.random.split(key, 3)
    params = init_discriminator_params(kp)

    real = jax.random.normal(kr, (2, 3, 16, 16), jnp.float32)
    fake = jax.random.normal(kf, (2, 3, 16, 16), jnp.float32)

    fwd = jax.jit(functools.partial(gan_loss_forward, params, config))
    total, parts = fwd(real, fake)
    jax.block_until_ready(total)
    jax.block_until_ready(parts)

    print("KERNEL_OK")
</pallas_src>

<mosaic_0001>
module attributes {stable_mosaic.version = 11 : i64} {
  func.func @_conv_mm_kernel(%arg0: i32, %arg1: i32, %arg2: memref<128x128xbf16, #tpu.memory_space<vmem>>, %arg3: memref<128x128xbf16, #tpu.memory_space<vmem>>, %arg4: memref<1x128xf32, #tpu.memory_space<vmem>>, %arg5: memref<128x128xf32, #tpu.memory_space<vmem>>, %arg6: memref<128x128xf32, #tpu.memory_space<vmem>>) attributes {dimension_semantics = [#tpu.dimension_semantics<parallel>, #tpu.dimension_semantics<arbitrary>], iteration_bounds = array<i64: 2, 1>, scalar_prefetch = 0 : i64, scratch_operands = 1 : i64, tpu.core_type = #tpu.core_type<tc>, window_params = [{transform_indices = @transform_0, window_bounds = array<i64: 128, 128>}, {transform_indices = @transform_1, window_bounds = array<i64: 128, 128>}, {pipeline_mode = #tpu.pipeline_mode<synchronous>, transform_indices = @transform_2, window_bounds = array<i64: 1, 128>}, {transform_indices = @transform_3, window_bounds = array<i64: 128, 128>}]} {
    %c0_i32 = arith.constant 0 : i32
    %0 = arith.cmpi eq, %arg1, %c0_i32 : i32
    %1 = arith.extui %0 : i1 to i32
    %c0_i32_0 = arith.constant 0 : i32
    %2 = arith.cmpi ne, %1, %c0_i32_0 : i32
    scf.if %2 {
      %cst_10 = arith.constant 0.000000e+00 : f32
      %12 = vector.broadcast %cst_10 : f32 to vector<128x128xf32>
      %c0_11 = arith.constant 0 : index
      %c0_12 = arith.constant 0 : index
      %13 = vector.load %arg6[%c0_11, %c0_12] : memref<128x128xf32, #tpu.memory_space<vmem>>, vector<128x128xf32>
      tpu.vector_store %arg6[%c0_11, %c0_12], %12 {strides = array<i32>} : memref<128x128xf32, #tpu.memory_space<vmem>>, vector<128x128xf32>,
    } else {
    }
    %c0 = arith.constant 0 : index
    %c0_1 = arith.constant 0 : index
    %3 = vector.load %arg6[%c0, %c0_1] : memref<128x128xf32, #tpu.memory_space<vmem>>, vector<128x128xf32>
    %c0_2 = arith.constant 0 : index
    %c0_3 = arith.constant 0 : index
    %4 = vector.load %arg2[%c0_2, %c0_3] : memref<128x128xbf16, #tpu.memory_space<vmem>>, vector<128x128xbf16>
    %c0_4 = arith.constant 0 : index
    %c0_5 = arith.constant 0 : index
    %5 = vector.load %arg3[%c0_4, %c0_5] : memref<128x128xbf16, #tpu.memory_space<vmem>>, vector<128x128xbf16>
    %cst = arith.constant dense<0.000000e+00> : vector<128x128xf32>
    %6 = tpu.matmul %4, %5, %cst {dimension_numbers = #tpu.dot_dimension_numbers<[1], [0], [0], [1], [0, 0, 1, 1], [], []>} : vector<128x128xbf16>, vector<128x128xbf16>, vector<128x128xf32> -> vector<128x128xf32>
    %7 = arith.addf %3, %6 : vector<128x128xf32>
    %c0_6 = arith.constant 0 : index
    %c0_7 = arith.constant 0 : index
    %8 = vector.load %arg6[%c0_6, %c0_7] : memref<128x128xf32, #tpu.memory_space<vmem>>, vector<128x128xf32>
    tpu.vector_store %arg6[%c0_6, %c0_7], %7 {strides = array<i32>} : memref<128x128xf32, #tpu.memory_space<vmem>>, vector<128x128xf32>,
    %c0_i32_8 = arith.constant 0 : i32
    %9 = arith.cmpi eq, %arg1, %c0_i32_8 : i32
    %10 = arith.extui %9 : i1 to i32
    %c0_i32_9 = arith.constant 0 : i32
    %11 = arith.cmpi ne, %10, %c0_i32_9 : i32
    scf.if %11 {
      %c0_10 = arith.constant 0 : index
      %c0_11 = arith.constant 0 : index
      %12 = vector.load %arg6[%c0_10, %c0_11] : memref<128x128xf32, #tpu.memory_space<vmem>>, vector<128x128xf32>
      %c0_12 = arith.constant 0 : index
      %c0_13 = arith.constant 0 : index
      %13 = vector.load %arg4[%c0_12, %c0_13] : memref<1x128xf32, #tpu.memory_space<vmem>>, vector<1x128xf32>
      %14 = vector.broadcast %13 : vector<1x128xf32> to vector<128x128xf32>
      %15 = arith.addf %12, %14 : vector<128x128xf32>
      %cst_14 = arith.constant 0.000000e+00 : f32
      %16 = vector.broadcast %cst_14 : f32 to vector<128x128xf32>
      %17 = arith.cmpf oge, %15, %16 : vector<128x128xf32>
      %cst_15 = arith.constant 2.000000e-01 : f32
      %18 = vector.broadcast %cst_15 : f32 to vector<128x128xf32>
      %19 = arith.mulf %18, %15 : vector<128x128xf32>
      %20 = arith.select %17, %15, %19 : vector<128x128xi1>, vector<128x128xf32>
      %c0_16 = arith.constant 0 : index
      %c0_17 = arith.constant 0 : index
      %21 = vector.load %arg5[%c0_16, %c0_17] : memref<128x128xf32, #tpu.memory_space<vmem>>, vector<128x128xf32>
      tpu.vector_store %arg5[%c0_16, %c0_17], %20 {strides = array<i32>} : memref<128x128xf32, #tpu.memory_space<vmem>>, vector<128x128xf32>,
    } else {
    }
    return
  }
  func.func @transform_0(%arg0: i32, %arg1: i32) -> (i32, i32) {
    %c0_i32 = arith.constant 0 : i32
    return %arg0, %arg1 : i32, i32
  }
  func.func @transform_1(%arg0: i32, %arg1: i32) -> (i32, i32) {
    %c0_i32 = arith.constant 0 : i32
    %c0_i32_0 = arith.constant 0 : i32
    return %arg1, %c0_i32 : i32, i32
  }
  func.func @transform_2(%arg0: i32, %arg1: i32) -> (i32, i32) {
    %c0_i32 = arith.constant 0 : i32
    %c0_i32_0 = arith.constant 0 : i32
    %c0_i32_1 = arith.constant 0 : i32
    return %c0_i32, %c0_i32_0 : i32, i32
  }
  func.func @transform_3(%arg0: i32, %arg1: i32) -> (i32, i32) {
    %c0_i32 = arith.constant 0 : i32
    %c0_i32_0 = arith.constant 0 : i32
    return %arg0, %c0_i32 : i32, i32
  }
}

module attributes {stable_mosaic.version = 11 : i64} {
  func.func @_conv_mm_kernel(%arg0: i32, %arg1: i32, %arg2: memref<64x128xbf16, #tpu.memory_space<vmem>>, %arg3: memref<128x128xbf16, #tpu.memory_space<vmem>>, %arg4: memref<1x128xf32, #tpu.memory_space<vmem>>, %arg5: memref<64x128xf32, #tpu.memory_space<vmem>>, %arg6: memref<64x128xf32, #tpu.memory_space<vmem>>) attributes {dimension_semantics = [#tpu.dimension_semantics<parallel>, #tpu.dimension_semantics<arbitrary>], iteration_bounds = array<i64: 1, 1>, scalar_prefetch = 0 : i64, scratch_operands = 1 : i64, tpu.core_type = #tpu.core_type<tc>, window_params = [{transform_indices = @transform_0, window_bounds = array<i64: 64, 128>}, {transform_indices = @transform_1, window_bounds = array<i64: 128, 128>}, {pipeline_mode = #tpu.pipeline_mode<synchronous>, transform_indices = @transform_2, window_bounds = array<i64: 1, 128>}, {transform_indices = @transform_3, window_bounds = array<i64: 64, 128>}]} {
    %c0_i32 = arith.constant 0 : i32
    %0 = arith.cmpi eq, %arg1, %c0_i32 : i32
    %1 = arith.extui %0 : i1 to i32
    %c0_i32_0 = arith.constant 0 : i32
    %2 = arith.cmpi ne, %1, %c0_i32_0 : i32
    scf.if %2 {
      %cst_10 = arith.constant 0.000000e+00 : f32
      %12 = vector.broadcast %cst_10 : f32 to vector<64x128xf32>
      %c0_11 = arith.constant 0 : index
      %c0_12 = arith.constant 0 : index
      %13 = vector.load %arg6[%c0_11, %c0_12] : memref<64x128xf32, #tpu.memory_space<vmem>>, vector<64x128xf32>
      tpu.vector_store %arg6[%c0_11, %c0_12], %12 {strides = array<i32>} : memref<64x128xf32, #tpu.memory_space<vmem>>, vector<64x128xf32>,
    } else {
    }
    %c0 = arith.constant 0 : index
    %c0_1 = arith.constant 0 : index
    %3 = vector.load %arg6[%c0, %c0_1] : memref<64x128xf32, #tpu.memory_space<vmem>>, vector<64x128xf32>
    %c0_2 = arith.constant 0 : index
    %c0_3 = arith.constant 0 : index
    %4 = vector.load %arg2[%c0_2, %c0_3] : memref<64x128xbf16, #tpu.memory_space<vmem>>, vector<64x128xbf16>
    %c0_4 = arith.constant 0 : index
    %c0_5 = arith.constant 0 : index
    %5 = vector.load %arg3[%c0_4, %c0_5] : memref<128x128xbf16, #tpu.memory_space<vmem>>, vector<128x128xbf16>
    %cst = arith.constant dense<0.000000e+00> : vector<64x128xf32>
    %6 = tpu.matmul %4, %5, %cst {dimension_numbers = #tpu.dot_dimension_numbers<[1], [0], [0], [1], [0, 0, 1, 1], [], []>} : vector<64x128xbf16>, vector<128x128xbf16>, vector<64x128xf32> -> vector<64x128xf32>
    %7 = arith.addf %3, %6 : vector<64x128xf32>
    %c0_6 = arith.constant 0 : index
    %c0_7 = arith.constant 0 : index
    %8 = vector.load %arg6[%c0_6, %c0_7] : memref<64x128xf32, #tpu.memory_space<vmem>>, vector<64x128xf32>
    tpu.vector_store %arg6[%c0_6, %c0_7], %7 {strides = array<i32>} : memref<64x128xf32, #tpu.memory_space<vmem>>, vector<64x128xf32>,
    %c0_i32_8 = arith.constant 0 : i32
    %9 = arith.cmpi eq, %arg1, %c0_i32_8 : i32
    %10 = arith.extui %9 : i1 to i32
    %c0_i32_9 = arith.constant 0 : i32
    %11 = arith.cmpi ne, %10, %c0_i32_9 : i32
    scf.if %11 {
      %c0_10 = arith.constant 0 : index
      %c0_11 = arith.constant 0 : index
      %12 = vector.load %arg6[%c0_10, %c0_11] : memref<64x128xf32, #tpu.memory_space<vmem>>, vector<64x128xf32>
      %c0_12 = arith.constant 0 : index
      %c0_13 = arith.constant 0 : index
      %13 = vector.load %arg4[%c0_12, %c0_13] : memref<1x128xf32, #tpu.memory_space<vmem>>, vector<1x128xf32>
      %14 = vector.broadcast %13 : vector<1x128xf32> to vector<64x128xf32>
      %15 = arith.addf %12, %14 : vector<64x128xf32>
      %cst_14 = arith.constant 0.000000e+00 : f32
      %16 = vector.broadcast %cst_14 : f32 to vector<64x128xf32>
      %17 = arith.cmpf oge, %15, %16 : vector<64x128xf32>
      %cst_15 = arith.constant 2.000000e-01 : f32
      %18 = vector.broadcast %cst_15 : f32 to vector<64x128xf32>
      %19 = arith.mulf %18, %15 : vector<64x128xf32>
      %20 = arith.select %17, %15, %19 : vector<64x128xi1>, vector<64x128xf32>
      %c0_16 = arith.constant 0 : index
      %c0_17 = arith.constant 0 : index
      %21 = vector.load %arg5[%c0_16, %c0_17] : memref<64x128xf32, #tpu.memory_space<vmem>>, vector<64x128xf32>
      tpu.vector_store %arg5[%c0_16, %c0_17], %20 {strides = array<i32>} : memref<64x128xf32, #tpu.memory_space<vmem>>, vector<64x128xf32>,
    } else {
    }
    return
  }
  func.func @transform_0(%arg0: i32, %arg1: i32) -> (i32, i32) {
    %c0_i32 = arith.constant 0 : i32
    return %arg0, %arg1 : i32, i32
  }
  func.func @transform_1(%arg0: i32, %arg1: i32) -> (i32, i32) {
    %c0_i32 = arith.constant 0 : i32
    %c0_i32_0 = arith.constant 0 : i32
    return %arg1, %c0_i32 : i32, i32
  }
  func.func @transform_2(%arg0: i32, %arg1: i32) -> (i32, i32) {
    %c0_i32 = arith.constant 0 : i32
    %c0_i32_0 = arith.constant 0 : i32
    %c0_i32_1 = arith.constant 0 : i32
    return %c0_i32, %c0_i32_0 : i32, i32
  }
  func.func @transform_3(%arg0: i32, %arg1: i32) -> (i32, i32) {
    %c0_i32 = arith.constant 0 : i32
    %c0_i32_0 = arith.constant 0 : i32
    return %arg0, %c0_i32 : i32, i32
  }
}

module attributes {stable_mosaic.version = 11 : i64} {
  func.func @_conv_mm_kernel(%arg0: i32, %arg1: i32, %arg2: memref<16x256xbf16, #tpu.memory_space<vmem>>, %arg3: memref<256x128xbf16, #tpu.memory_space<vmem>>, %arg4: memref<1x128xf32, #tpu.memory_space<vmem>>, %arg5: memref<16x128xf32, #tpu.memory_space<vmem>>, %arg6: memref<16x128xf32, #tpu.memory_space<vmem>>) attributes {dimension_semantics = [#tpu.dimension_semantics<parallel>, #tpu.dimension_semantics<arbitrary>], iteration_bounds = array<i64: 1, 1>, scalar_prefetch = 0 : i64, scratch_operands = 1 : i64, tpu.core_type = #tpu.core_type<tc>, window_params = [{transform_indices = @transform_0, window_bounds = array<i64: 16, 256>}, {transform_indices = @transform_1, window_bounds = array<i64: 256, 128>}, {pipeline_mode = #tpu.pipeline_mode<synchronous>, transform_indices = @transform_2, window_bounds = array<i64: 1, 128>}, {transform_indices = @transform_3, window_bounds = array<i64: 16, 128>}]} {
    %c0_i32 = arith.constant 0 : i32
    %0 = arith.cmpi eq, %arg1, %c0_i32 : i32
    %1 = arith.extui %0 : i1 to i32
    %c0_i32_0 = arith.constant 0 : i32
    %2 = arith.cmpi ne, %1, %c0_i32_0 : i32
    scf.if %2 {
      %cst_10 = arith.constant 0.000000e+00 : f32
      %12 = vector.broadcast %cst_10 : f32 to vector<16x128xf32>
      %c0_11 = arith.constant 0 : index
      %c0_12 = arith.constant 0 : index
      %13 = vector.load %arg6[%c0_11, %c0_12] : memref<16x128xf32, #tpu.memory_space<vmem>>, vector<16x128xf32>
      tpu.vector_store %arg6[%c0_11, %c0_12], %12 {strides = array<i32>} : memref<16x128xf32, #tpu.memory_space<vmem>>, vector<16x128xf32>,
    } else {
    }
    %c0 = arith.constant 0 : index
    %c0_1 = arith.constant 0 : index
    %3 = vector.load %arg6[%c0, %c0_1] : memref<16x128xf32, #tpu.memory_space<vmem>>, vector<16x128xf32>
    %c0_2 = arith.constant 0 : index
    %c0_3 = arith.constant 0 : index
    %4 = vector.load %arg2[%c0_2, %c0_3] : memref<16x256xbf16, #tpu.memory_space<vmem>>, vector<16x256xbf16>
    %c0_4 = arith.constant 0 : index
    %c0_5 = arith.constant 0 : index
    %5 = vector.load %arg3[%c0_4, %c0_5] : memref<256x128xbf16, #tpu.memory_space<vmem>>, vector<256x128xbf16>
    %cst = arith.constant dense<0.000000e+00> : vector<16x128xf32>
    %6 = tpu.matmul %4, %5, %cst {dimension_numbers = #tpu.dot_dimension_numbers<[1], [0], [0], [1], [0, 0, 1, 1], [], []>} : vector<16x256xbf16>, vector<256x128xbf16>, vector<16x128xf32> -> vector<16x128xf32>
    %7 = arith.addf %3, %6 : vector<16x128xf32>
    %c0_6 = arith.constant 0 : index
    %c0_7 = arith.constant 0 : index
    %8 = vector.load %arg6[%c0_6, %c0_7] : memref<16x128xf32, #tpu.memory_space<vmem>>, vector<16x128xf32>
    tpu.vector_store %arg6[%c0_6, %c0_7], %7 {strides = array<i32>} : memref<16x128xf32, #tpu.memory_space<vmem>>, vector<16x128xf32>,
    %c0_i32_8 = arith.constant 0 : i32
    %9 = arith.cmpi eq, %arg1, %c0_i32_8 : i32
    %10 = arith.extui %9 : i1 to i32
    %c0_i32_9 = arith.constant 0 : i32
    %11 = arith.cmpi ne, %10, %c0_i32_9 : i32
    scf.if %11 {
      %c0_10 = arith.constant 0 : index
      %c0_11 = arith.constant 0 : index
      %12 = vector.load %arg6[%c0_10, %c0_11] : memref<16x128xf32, #tpu.memory_space<vmem>>, vector<16x128xf32>
      %c0_12 = arith.constant 0 : index
      %c0_13 = arith.constant 0 : index
      %13 = vector.load %arg4[%c0_12, %c0_13] : memref<1x128xf32, #tpu.memory_space<vmem>>, vector<1x128xf32>
      %14 = vector.broadcast %13 : vector<1x128xf32> to vector<16x128xf32>
      %15 = arith.addf %12, %14 : vector<16x128xf32>
      %cst_14 = arith.constant 0.000000e+00 : f32
      %16 = vector.broadcast %cst_14 : f32 to vector<16x128xf32>
      %17 = arith.cmpf oge, %15, %16 : vector<16x128xf32>
      %cst_15 = arith.constant 2.000000e-01 : f32
      %18 = vector.broadcast %cst_15 : f32 to vector<16x128xf32>
      %19 = arith.mulf %18, %15 : vector<16x128xf32>
      %20 = arith.select %17, %15, %19 : vector<16x128xi1>, vector<16x128xf32>
      %c0_16 = arith.constant 0 : index
      %c0_17 = arith.constant 0 : index
      %21 = vector.load %arg5[%c0_16, %c0_17] : memref<16x128xf32, #tpu.memory_space<vmem>>, vector<16x128xf32>
      tpu.vector_store %arg5[%c0_16, %c0_17], %20 {strides = array<i32>} : memref<16x128xf32, #tpu.memory_space<vmem>>, vector<16x128xf32>,
    } else {
    }
    return
  }
  func.func @transform_0(%arg0: i32, %arg1: i32) -> (i32, i32) {
    %c0_i32 = arith.constant 0 : i32
    return %arg0, %arg1 : i32, i32
  }
  func.func @transform_1(%arg0: i32, %arg1: i32) -> (i32, i32) {
    %c0_i32 = arith.constant 0 : i32
    %c0_i32_0 = arith.constant 0 : i32
    return %arg1, %c0_i32 : i32, i32
  }
  func.func @transform_2(%arg0: i32, %arg1: i32) -> (i32, i32) {
    %c0_i32 = arith.constant 0 : i32
    %c0_i32_0 = arith.constant 0 : i32
    %c0_i32_1 = arith.constant 0 : i32
    return %c0_i32, %c0_i32_0 : i32, i32
  }
  func.func @transform_3(%arg0: i32, %arg1: i32) -> (i32, i32) {
    %c0_i32 = arith.constant 0 : i32
    %c0_i32_0 = arith.constant 0 : i32
    return %arg0, %c0_i32 : i32, i32
  }
}

module attributes {stable_mosaic.version = 11 : i64} {
  func.func @_conv_mm_kernel(%arg0: i32, %arg1: i32, %arg2: memref<16x128xbf16, #tpu.memory_space<vmem>>, %arg3: memref<128x128xbf16, #tpu.memory_space<vmem>>, %arg4: memref<1x128xf32, #tpu.memory_space<vmem>>, %arg5: memref<16x128xf32, #tpu.memory_space<vmem>>, %arg6: memref<16x128xf32, #tpu.memory_space<vmem>>) attributes {dimension_semantics = [#tpu.dimension_semantics<parallel>, #tpu.dimension_semantics<arbitrary>], iteration_bounds = array<i64: 1, 1>, scalar_prefetch = 0 : i64, scratch_operands = 1 : i64, tpu.core_type = #tpu.core_type<tc>, window_params = [{transform_indices = @transform_0, window_bounds = array<i64: 16, 128>}, {transform_indices = @transform_1, window_bounds = array<i64: 128, 128>}, {pipeline_mode = #tpu.pipeline_mode<synchronous>, transform_indices = @transform_2, window_bounds = array<i64: 1, 128>}, {transform_indices = @transform_3, window_bounds = array<i64: 16, 128>}]} {
    %c0_i32 = arith.constant 0 : i32
    %0 = arith.cmpi eq, %arg1, %c0_i32 : i32
    %1 = arith.extui %0 : i1 to i32
    %c0_i32_0 = arith.constant 0 : i32
    %2 = arith.cmpi ne, %1, %c0_i32_0 : i32
    scf.if %2 {
      %cst_10 = arith.constant 0.000000e+00 : f32
      %12 = vector.broadcast %cst_10 : f32 to vector<16x128xf32>
      %c0_11 = arith.constant 0 : index
      %c0_12 = arith.constant 0 : index
      %13 = vector.load %arg6[%c0_11, %c0_12] : memref<16x128xf32, #tpu.memory_space<vmem>>, vector<16x128xf32>
      tpu.vector_store %arg6[%c0_11, %c0_12], %12 {strides = array<i32>} : memref<16x128xf32, #tpu.memory_space<vmem>>, vector<16x128xf32>,
    } else {
    }
    %c0 = arith.constant 0 : index
    %c0_1 = arith.constant 0 : index
    %3 = vector.load %arg6[%c0, %c0_1] : memref<16x128xf32, #tpu.memory_space<vmem>>, vector<16x128xf32>
    %c0_2 = arith.constant 0 : index
    %c0_3 = arith.constant 0 : index
    %4 = vector.load %arg2[%c0_2, %c0_3] : memref<16x128xbf16, #tpu.memory_space<vmem>>, vector<16x128xbf16>
    %c0_4 = arith.constant 0 : index
    %c0_5 = arith.constant 0 : index
    %5 = vector.load %arg3[%c0_4, %c0_5] : memref<128x128xbf16, #tpu.memory_space<vmem>>, vector<128x128xbf16>
    %cst = arith.constant dense<0.000000e+00> : vector<16x128xf32>
    %6 = tpu.matmul %4, %5, %cst {dimension_numbers = #tpu.dot_dimension_numbers<[1], [0], [0], [1], [0, 0, 1, 1], [], []>} : vector<16x128xbf16>, vector<128x128xbf16>, vector<16x128xf32> -> vector<16x128xf32>
    %7 = arith.addf %3, %6 : vector<16x128xf32>
    %c0_6 = arith.constant 0 : index
    %c0_7 = arith.constant 0 : index
    %8 = vector.load %arg6[%c0_6, %c0_7] : memref<16x128xf32, #tpu.memory_space<vmem>>, vector<16x128xf32>
    tpu.vector_store %arg6[%c0_6, %c0_7], %7 {strides = array<i32>} : memref<16x128xf32, #tpu.memory_space<vmem>>, vector<16x128xf32>,
    %c0_i32_8 = arith.constant 0 : i32
    %9 = arith.cmpi eq, %arg1, %c0_i32_8 : i32
    %10 = arith.extui %9 : i1 to i32
    %c0_i32_9 = arith.constant 0 : i32
    %11 = arith.cmpi ne, %10, %c0_i32_9 : i32
    scf.if %11 {
      %c0_10 = arith.constant 0 : index
      %c0_11 = arith.constant 0 : index
      %12 = vector.load %arg6[%c0_10, %c0_11] : memref<16x128xf32, #tpu.memory_space<vmem>>, vector<16x128xf32>
      %c0_12 = arith.constant 0 : index
      %c0_13 = arith.constant 0 : index
      %13 = vector.load %arg4[%c0_12, %c0_13] : memref<1x128xf32, #tpu.memory_space<vmem>>, vector<1x128xf32>
      %14 = vector.broadcast %13 : vector<1x128xf32> to vector<16x128xf32>
      %15 = arith.addf %12, %14 : vector<16x128xf32>
      %cst_14 = arith.constant 0.000000e+00 : f32
      %16 = vector.broadcast %cst_14 : f32 to vector<16x128xf32>
      %17 = arith.cmpf oge, %15, %16 : vector<16x128xf32>
      %cst_15 = arith.constant 2.000000e-01 : f32
      %18 = vector.broadcast %cst_15 : f32 to vector<16x128xf32>
      %19 = arith.mulf %18, %15 : vector<16x128xf32>
      %20 = arith.select %17, %15, %19 : vector<16x128xi1>, vector<16x128xf32>
      %c0_16 = arith.constant 0 : index
      %c0_17 = arith.constant 0 : index
      %21 = vector.load %arg5[%c0_16, %c0_17] : memref<16x128xf32, #tpu.memory_space<vmem>>, vector<16x128xf32>
      tpu.vector_store %arg5[%c0_16, %c0_17], %20 {strides = array<i32>} : memref<16x128xf32, #tpu.memory_space<vmem>>, vector<16x128xf32>,
    } else {
    }
    return
  }
  func.func @transform_0(%arg0: i32, %arg1: i32) -> (i32, i32) {
    %c0_i32 = arith.constant 0 : i32
    return %arg0, %arg1 : i32, i32
  }
  func.func @transform_1(%arg0: i32, %arg1: i32) -> (i32, i32) {
    %c0_i32 = arith.constant 0 : i32
    %c0_i32_0 = arith.constant 0 : i32
    return %arg1, %c0_i32 : i32, i32
  }
  func.func @transform_2(%arg0: i32, %arg1: i32) -> (i32, i32) {
    %c0_i32 = arith.constant 0 : i32
    %c0_i32_0 = arith.constant 0 : i32
    %c0_i32_1 = arith.constant 0 : i32
    return %c0_i32, %c0_i32_0 : i32, i32
  }
  func.func @transform_3(%arg0: i32, %arg1: i32) -> (i32, i32) {
    %c0_i32 = arith.constant 0 : i32
    %c0_i32_0 = arith.constant 0 : i32
    return %arg0, %c0_i32 : i32, i32
  }
}

module attributes {stable_mosaic.version = 11 : i64} {
  func.func @_conv_mm_kernel(%arg0: i32, %arg1: i32, %arg2: memref<8x256xbf16, #tpu.memory_space<vmem>>, %arg3: memref<256x128xbf16, #tpu.memory_space<vmem>>, %arg4: memref<1x128xf32, #tpu.memory_space<vmem>>, %arg5: memref<8x128xf32, #tpu.memory_space<vmem>>, %arg6: memref<8x128xf32, #tpu.memory_space<vmem>>) attributes {dimension_semantics = [#tpu.dimension_semantics<parallel>, #tpu.dimension_semantics<arbitrary>], iteration_bounds = array<i64: 1, 1>, scalar_prefetch = 0 : i64, scratch_operands = 1 : i64, tpu.core_type = #tpu.core_type<tc>, window_params = [{transform_indices = @transform_0, window_bounds = array<i64: 8, 256>}, {transform_indices = @transform_1, window_bounds = array<i64: 256, 128>}, {pipeline_mode = #tpu.pipeline_mode<synchronous>, transform_indices = @transform_2, window_bounds = array<i64: 1, 128>}, {transform_indices = @transform_3, window_bounds = array<i64: 8, 128>}]} {
    %c0_i32 = arith.constant 0 : i32
    %0 = arith.cmpi eq, %arg1, %c0_i32 : i32
    %1 = arith.extui %0 : i1 to i32
    %c0_i32_0 = arith.constant 0 : i32
    %2 = arith.cmpi ne, %1, %c0_i32_0 : i32
    scf.if %2 {
      %cst_10 = arith.constant 0.000000e+00 : f32
      %12 = vector.broadcast %cst_10 : f32 to vector<8x128xf32>
      %c0_11 = arith.constant 0 : index
      %c0_12 = arith.constant 0 : index
      %13 = vector.load %arg6[%c0_11, %c0_12] : memref<8x128xf32, #tpu.memory_space<vmem>>, vector<8x128xf32>
      tpu.vector_store %arg6[%c0_11, %c0_12], %12 {strides = array<i32>} : memref<8x128xf32, #tpu.memory_space<vmem>>, vector<8x128xf32>,
    } else {
    }
    %c0 = arith.constant 0 : index
    %c0_1 = arith.constant 0 : index
    %3 = vector.load %arg6[%c0, %c0_1] : memref<8x128xf32, #tpu.memory_space<vmem>>, vector<8x128xf32>
    %c0_2 = arith.constant 0 : index
    %c0_3 = arith.constant 0 : index
    %4 = vector.load %arg2[%c0_2, %c0_3] : memref<8x256xbf16, #tpu.memory_space<vmem>>, vector<8x256xbf16>
    %c0_4 = arith.constant 0 : index
    %c0_5 = arith.constant 0 : index
    %5 = vector.load %arg3[%c0_4, %c0_5] : memref<256x128xbf16, #tpu.memory_space<vmem>>, vector<256x128xbf16>
    %cst = arith.constant dense<0.000000e+00> : vector<8x128xf32>
    %6 = tpu.matmul %4, %5, %cst {dimension_numbers = #tpu.dot_dimension_numbers<[1], [0], [0], [1], [0, 0, 1, 1], [], []>} : vector<8x256xbf16>, vector<256x128xbf16>, vector<8x128xf32> -> vector<8x128xf32>
    %7 = arith.addf %3, %6 : vector<8x128xf32>
    %c0_6 = arith.constant 0 : index
    %c0_7 = arith.constant 0 : index
    %8 = vector.load %arg6[%c0_6, %c0_7] : memref<8x128xf32, #tpu.memory_space<vmem>>, vector<8x128xf32>
    tpu.vector_store %arg6[%c0_6, %c0_7], %7 {strides = array<i32>} : memref<8x128xf32, #tpu.memory_space<vmem>>, vector<8x128xf32>,
    %c0_i32_8 = arith.constant 0 : i32
    %9 = arith.cmpi eq, %arg1, %c0_i32_8 : i32
    %10 = arith.extui %9 : i1 to i32
    %c0_i32_9 = arith.constant 0 : i32
    %11 = arith.cmpi ne, %10, %c0_i32_9 : i32
    scf.if %11 {
      %c0_10 = arith.constant 0 : index
      %c0_11 = arith.constant 0 : index
      %12 = vector.load %arg6[%c0_10, %c0_11] : memref<8x128xf32, #tpu.memory_space<vmem>>, vector<8x128xf32>
      %c0_12 = arith.constant 0 : index
      %c0_13 = arith.constant 0 : index
      %13 = vector.load %arg4[%c0_12, %c0_13] : memref<1x128xf32, #tpu.memory_space<vmem>>, vector<1x128xf32>
      %14 = vector.broadcast %13 : vector<1x128xf32> to vector<8x128xf32>
      %15 = arith.addf %12, %14 : vector<8x128xf32>
      %cst_14 = arith.constant 0.000000e+00 : f32
      %16 = vector.broadcast %cst_14 : f32 to vector<8x128xf32>
      %17 = arith.cmpf oge, %15, %16 : vector<8x128xf32>
      %cst_15 = arith.constant 2.000000e-01 : f32
      %18 = vector.broadcast %cst_15 : f32 to vector<8x128xf32>
      %19 = arith.mulf %18, %15 : vector<8x128xf32>
      %20 = arith.select %17, %15, %19 : vector<8x128xi1>, vector<8x128xf32>
      %c0_16 = arith.constant 0 : index
      %c0_17 = arith.constant 0 : index
      %21 = vector.load %arg5[%c0_16, %c0_17] : memref<8x128xf32, #tpu.memory_space<vmem>>, vector<8x128xf32>
      tpu.vector_store %arg5[%c0_16, %c0_17], %20 {strides = array<i32>} : memref<8x128xf32, #tpu.memory_space<vmem>>, vector<8x128xf32>,
    } else {
    }
    return
  }
  func.func @transform_0(%arg0: i32, %arg1: i32) -> (i32, i32) {
    %c0_i32 = arith.constant 0 : i32
    return %arg0, %arg1 : i32, i32
  }
  func.func @transform_1(%arg0: i32, %arg1: i32) -> (i32, i32) {
    %c0_i32 = arith.constant 0 : i32
    %c0_i32_0 = arith.constant 0 : i32
    return %arg1, %c0_i32 : i32, i32
  }
  func.func @transform_2(%arg0: i32, %arg1: i32) -> (i32, i32) {
    %c0_i32 = arith.constant 0 : i32
    %c0_i32_0 = arith.constant 0 : i32
    %c0_i32_1 = arith.constant 0 : i32
    return %c0_i32, %c0_i32_0 : i32, i32
  }
  func.func @transform_3(%arg0: i32, %arg1: i32) -> (i32, i32) {
    %c0_i32 = arith.constant 0 : i32
    %c0_i32_0 = arith.constant 0 : i32
    return %arg0, %c0_i32 : i32, i32
  }
}

module attributes {stable_mosaic.version = 11 : i64} {
  func.func @_fm_l1_kernel(%arg0: i32, %arg1: memref<24x128xf32, #tpu.memory_space<vmem>>, %arg2: memref<24x128xf32, #tpu.memory_space<vmem>>, %arg3: memref<24x128xf32, #tpu.memory_space<vmem>>, %arg4: memref<1x1xf32, #tpu.memory_space<smem>>, %arg5: memref<1xf32, #tpu.memory_space<smem>>) attributes {dimension_semantics = [#tpu.dimension_semantics<arbitrary>], iteration_bounds = array<i64: 1>, scalar_prefetch = 0 : i64, scratch_operands = 1 : i64, tpu.core_type = #tpu.core_type<tc>, window_params = [{transform_indices = @transform_0, window_bounds = array<i64: 24, 128>}, {transform_indices = @transform_1, window_bounds = array<i64: 24, 128>}, {transform_indices = @transform_2, window_bounds = array<i64: 24, 128>}, {transform_indices = @transform_3, window_bounds = array<i64: 1, 1>}]} {
    %c0_i32 = arith.constant 0 : i32
    %0 = arith.cmpi eq, %arg0, %c0_i32 : i32
    %1 = arith.extui %0 : i1 to i32
    %c0_i32_0 = arith.constant 0 : i32
    %2 = arith.cmpi ne, %1, %c0_i32_0 : i32
    scf.if %2 {
      %cst_10 = arith.constant 0.000000e+00 : f32
      %c0_11 = arith.constant 0 : index
      %19 = memref.load %arg5[%c0_11] : memref<1xf32, #tpu.memory_space<smem>>
      memref.store %cst_10, %arg5[%c0_11] : memref<1xf32, #tpu.memory_space<smem>>
    } else {
    }
    %c0 = arith.constant 0 : index
    %3 = memref.load %arg5[%c0] : memref<1xf32, #tpu.memory_space<smem>>
    %c0_1 = arith.constant 0 : index
    %c0_2 = arith.constant 0 : index
    %4 = vector.load %arg3[%c0_1, %c0_2] : memref<24x128xf32, #tpu.memory_space<vmem>>, vector<24x128xf32>
    %c0_3 = arith.constant 0 : index
    %c0_4 = arith.constant 0 : index
    %5 = vector.load %arg1[%c0_3, %c0_4] : memref<24x128xf32, #tpu.memory_space<vmem>>, vector<24x128xf32>
    %c0_5 = arith.constant 0 : index
    %c0_6 = arith.constant 0 : index
    %6 = vector.load %arg2[%c0_5, %c0_6] : memref<24x128xf32, #tpu.memory_space<vmem>>, vector<24x128xf32>
    %7 = arith.subf %5, %6 : vector<24x128xf32>
    %8 = math.absf %7 : vector<24x128xf32>
    %9 = arith.mulf %4, %8 : vector<24x128xf32>
    %10 = vector.shape_cast %9 : vector<24x128xf32> to vector<1x24x128xf32>
    %cst = arith.constant dense<0.000000e+00> : vector<1xf32>
    %11 = vector.multi_reduction <add>, %10, %cst [1, 2] : vector<1x24x128xf32> to vector<1xf32>
    %12 = vector.shape_cast %11 : vector<1xf32> to vector<1x1x1xf32>
    %13 = vector.extract %12[0, 0, 0] : f32 from vector<1x1x1xf32>
    %14 = arith.addf %3, %13 : f32
    %c0_7 = arith.constant 0 : index
    %15 = memref.load %arg5[%c0_7] : memref<1xf32, #tpu.memory_space<smem>>
    memref.store %14, %arg5[%c0_7] : memref<1xf32, #tpu.memory_space<smem>>
    %c0_i32_8 = arith.constant 0 : i32
    %16 = arith.cmpi eq, %arg0, %c0_i32_8 : i32
    %17 = arith.extui %16 : i1 to i32
    %c0_i32_9 = arith.constant 0 : i32
    %18 = arith.cmpi ne, %17, %c0_i32_9 : i32
    scf.if %18 {
      %c0_10 = arith.constant 0 : index
      %19 = memref.load %arg5[%c0_10] : memref<1xf32, #tpu.memory_space<smem>>
      %c0_11 = arith.constant 0 : index
      %c0_12 = arith.constant 0 : index
      %20 = memref.load %arg4[%c0_11, %c0_12] : memref<1x1xf32, #tpu.memory_space<smem>>
      memref.store %19, %arg4[%c0_11, %c0_12] : memref<1x1xf32, #tpu.memory_space<smem>>
    } else {
    }
    return
  }
  func.func @transform_0(%arg0: i32) -> (i32, i32) {
    %c0_i32 = arith.constant 0 : i32
    %c0_i32_0 = arith.constant 0 : i32
    return %arg0, %c0_i32 : i32, i32
  }
  func.func @transform_1(%arg0: i32) -> (i32, i32) {
    %c0_i32 = arith.constant 0 : i32
    %c0_i32_0 = arith.constant 0 : i32
    return %arg0, %c0_i32 : i32, i32
  }
  func.func @transform_2(%arg0: i32) -> (i32, i32) {
    %c0_i32 = arith.constant 0 : i32
    %c0_i32_0 = arith.constant 0 : i32
    return %arg0, %c0_i32 : i32, i32
  }
  func.func @transform_3(%arg0: i32) -> (i32, i32) {
    %c0_i32 = arith.constant 0 : i32
    %c0_i32_0 = arith.constant 0 : i32
    %c0_i32_1 = arith.constant 0 : i32
    return %c0_i32, %c0_i32_0 : i32, i32
  }
}

module attributes {stable_mosaic.version = 11 : i64} {
  func.func @_final_hinge_kernel(%arg0: i32, %arg1: i32, %arg2: memref<8x384xbf16, #tpu.memory_space<vmem>>, %arg3: memref<384x128xbf16, #tpu.memory_space<vmem>>, %arg4: memref<1x128xf32, #tpu.memory_space<vmem>>, %arg5: memref<1x1xf32, #tpu.memory_space<smem>>, %arg6: memref<1x1xf32, #tpu.memory_space<smem>>, %arg7: memref<8x128xf32, #tpu.memory_space<vmem>>, %arg8: memref<2xf32, #tpu.memory_space<smem>>) attributes {dimension_semantics = [#tpu.dimension_semantics<arbitrary>, #tpu.dimension_semantics<arbitrary>], iteration_bounds = array<i64: 1, 1>, scalar_prefetch = 0 : i64, scratch_operands = 2 : i64, tpu.core_type = #tpu.core_type<tc>, window_params = [{transform_indices = @transform_0, window_bounds = array<i64: 8, 384>}, {transform_indices = @transform_1, window_bounds = array<i64: 384, 128>}, {pipeline_mode = #tpu.pipeline_mode<synchronous>, transform_indices = @transform_2, window_bounds = array<i64: 1, 128>}, {transform_indices = @transform_3, window_bounds = array<i64: 1, 1>}, {transform_indices = @transform_4, window_bounds = array<i64: 1, 1>}]} {
    %c0_i32 = arith.constant 0 : i32
    %0 = arith.cmpi eq, %arg0, %c0_i32 : i32
    %c0_i32_0 = arith.constant 0 : i32
    %1 = arith.cmpi eq, %arg1, %c0_i32_0 : i32
    %2 = arith.andi %0, %1 : i1
    %3 = arith.extui %2 : i1 to i32
    %c0_i32_1 = arith.constant 0 : i32
    %4 = arith.cmpi ne, %3, %c0_i32_1 : i32
    scf.if %4 {
      %cst_16 = arith.constant 0.000000e+00 : f32
      %c0_17 = arith.constant 0 : index
      %22 = memref.load %arg8[%c0_17] : memref<2xf32, #tpu.memory_space<smem>>
      memref.store %cst_16, %arg8[%c0_17] : memref<2xf32, #tpu.memory_space<smem>>
      %cst_18 = arith.constant 0.000000e+00 : f32
      %c1 = arith.constant 1 : index
      %23 = memref.load %arg8[%c1] : memref<2xf32, #tpu.memory_space<smem>>
      memref.store %cst_18, %arg8[%c1] : memref<2xf32, #tpu.memory_space<smem>>
    } else {
    }
    %c0_i32_2 = arith.constant 0 : i32
    %5 = arith.cmpi eq, %arg1, %c0_i32_2 : i32
    %6 = arith.extui %5 : i1 to i32
    %c0_i32_3 = arith.constant 0 : i32
    %7 = arith.cmpi ne, %6, %c0_i32_3 : i32
    scf.if %7 {
      %cst_16 = arith.constant 0.000000e+00 : f32
      %22 = vector.broadcast %cst_16 : f32 to vector<8x128xf32>
      %c0_17 = arith.constant 0 : index
      %c0_18 = arith.constant 0 : index
      %23 = vector.load %arg7[%c0_17, %c0_18] : memref<8x128xf32, #tpu.memory_space<vmem>>, vector<8x128xf32>
      tpu.vector_store %arg7[%c0_17, %c0_18], %22 {strides = array<i32>} : memref<8x128xf32, #tpu.memory_space<vmem>>, vector<8x128xf32>,
    } else {
    }
    %c0 = arith.constant 0 : index
    %c0_4 = arith.constant 0 : index
    %8 = vector.load %arg7[%c0, %c0_4] : memref<8x128xf32, #tpu.memory_space<vmem>>, vector<8x128xf32>
    %c0_5 = arith.constant 0 : index
    %c0_6 = arith.constant 0 : index
    %9 = vector.load %arg2[%c0_5, %c0_6] : memref<8x384xbf16, #tpu.memory_space<vmem>>, vector<8x384xbf16>
    %c0_7 = arith.constant 0 : index
    %c0_8 = arith.constant 0 : index
    %10 = vector.load %arg3[%c0_7, %c0_8] : memref<384x128xbf16, #tpu.memory_space<vmem>>, vector<384x128xbf16>
    %cst = arith.constant dense<0.000000e+00> : vector<8x128xf32>
    %11 = tpu.matmul %9, %10, %cst {dimension_numbers = #tpu.dot_dimension_numbers<[1], [0], [0], [1], [0, 0, 1, 1], [], []>} : vector<8x384xbf16>, vector<384x128xbf16>, vector<8x128xf32> -> vector<8x128xf32>
    %12 = arith.addf %8, %11 : vector<8x128xf32>
    %c0_9 = arith.constant 0 : index
    %c0_10 = arith.constant 0 : index
    %13 = vector.load %arg7[%c0_9, %c0_10] : memref<8x128xf32, #tpu.memory_space<vmem>>, vector<8x128xf32>
    tpu.vector_store %arg7[%c0_9, %c0_10], %12 {strides = array<i32>} : memref<8x128xf32, #tpu.memory_space<vmem>>, vector<8x128xf32>,
    %c0_i32_11 = arith.constant 0 : i32
    %14 = arith.cmpi eq, %arg1, %c0_i32_11 : i32
    %15 = arith.extui %14 : i1 to i32
    %c0_i32_12 = arith.constant 0 : i32
    %16 = arith.cmpi ne, %15, %c0_i32_12 : i32
    scf.if %16 {
      %c0_16 = arith.constant 0 : index
      %c0_17 = arith.constant 0 : index
      %22 = vector.load %arg7[%c0_16, %c0_17] : memref<8x128xf32, #tpu.memory_space<vmem>>, vector<8x128xf32>
      %c0_18 = arith.constant 0 : index
      %c0_19 = arith.constant 0 : index
      %23 = vector.load %arg4[%c0_18, %c0_19] : memref<1x128xf32, #tpu.memory_space<vmem>>, vector<1x128xf32>
      %24 = vector.broadcast %23 : vector<1x128xf32> to vector<8x128xf32>
      %25 = arith.addf %22, %24 : vector<8x128xf32>
      %26 = tpu.iota {dimensions = array<i32: 0>} : vector<8x128xi32>
      %c8_i32 = arith.constant 8 : i32
      %27 = arith.muli %arg0, %c8_i32 : i32
      %28 = vector.broadcast %27 : i32 to vector<8x128xi32>
      %29 = arith.addi %26, %28 : vector<8x128xi32>
      %30 = tpu.iota {dimensions = array<i32: 1>} : vector<8x128xi32>
      %c0_i32_20 = arith.constant 0 : i32
      %31 = vector.broadcast %c0_i32_20 : i32 to vector<8x128xi32>
      %32 = arith.cmpi eq, %30, %31 : vector<8x128xi32>
      %c2_i32 = arith.constant 2 : i32
      %33 = vector.broadcast %c2_i32 : i32 to vector<8x128xi32>
      %34 = arith.cmpi slt, %29, %33 : vector<8x128xi32>
      %35 = arith.andi %32, %34 : vector<8x128xi1>
      %c2_i32_21 = arith.constant 2 : i32
      %36 = vector.broadcast %c2_i32_21 : i32 to vector<8x128xi32>
      %37 = arith.cmpi sge, %29, %36 : vector<8x128xi32>
      %c4_i32 = arith.constant 4 : i32
      %38 = vector.broadcast %c4_i32 : i32 to vector<8x128xi32>
      %39 = arith.cmpi slt, %29, %38 : vector<8x128xi32>
      %40 = arith.andi %37, %39 : vector<8x128xi1>
      %41 = arith.andi %32, %40 : vector<8x128xi1>
      %c0_22 = arith.constant 0 : index
      %42 = memref.load %arg8[%c0_22] : memref<2xf32, #tpu.memory_space<smem>>
      %cst_23 = arith.constant 1.000000e+00 : f32
      %43 = vector.broadcast %cst_23 : f32 to vector<8x128xf32>
      %44 = arith.subf %43, %25 : vector<8x128xf32>
      %cst_24 = arith.constant 0.000000e+00 : f32
      %45 = vector.broadcast %cst_24 : f32 to vector<8x128xf32>
      %46 = arith.maximumf %44, %45 : vector<8x128xf32>
      %cst_25 = arith.constant 0.000000e+00 : f32
      %47 = vector.broadcast %cst_25 : f32 to vector<8x128xf32>
      %48 = arith.select %35, %46, %47 : vector<8x128xi1>, vector<8x128xf32>
      %49 = vector.shape_cast %48 : vector<8x128xf32> to vector<1x8x128xf32>
      %cst_26 = arith.constant dense<0.000000e+00> : vector<1xf32>
      %50 = vector.multi_reduction <add>, %49, %cst_26 [1, 2] : vector<1x8x128xf32> to vector<1xf32>
      %51 = vector.shape_cast %50 : vector<1xf32> to vector<1x1x1xf32>
      %52 = vector.extract %51[0, 0, 0] : f32 from vector<1x1x1xf32>
      %53 = arith.addf %42, %52 : f32
      %c0_27 = arith.constant 0 : index
      %54 = memref.load %arg8[%c0_27] : memref<2xf32, #tpu.memory_space<smem>>
      memref.store %53, %arg8[%c0_27] : memref<2xf32, #tpu.memory_space<smem>>
      %c1 = arith.constant 1 : index
      %55 = memref.load %arg8[%c1] : memref<2xf32, #tpu.memory_space<smem>>
      %cst_28 = arith.constant 1.000000e+00 : f32
      %56 = vector.broadcast %cst_28 : f32 to vector<8x128xf32>
      %57 = arith.addf %56, %25 : vector<8x128xf32>
      %cst_29 = arith.constant 0.000000e+00 : f32
      %58 = vector.broadcast %cst_29 : f32 to vector<8x128xf32>
      %59 = arith.maximumf %57, %58 : vector<8x128xf32>
      %cst_30 = arith.constant 0.000000e+00 : f32
      %60 = vector.broadcast %cst_30 : f32 to vector<8x128xf32>
      %61 = arith.select %41, %59, %60 : vector<8x128xi1>, vector<8x128xf32>
      %62 = vector.shape_cast %61 : vector<8x128xf32> to vector<1x8x128xf32>
      %cst_31 = arith.constant dense<0.000000e+00> : vector<1xf32>
      %63 = vector.multi_reduction <add>, %62, %cst_31 [1, 2] : vector<1x8x128xf32> to vector<1xf32>
      %64 = vector.shape_cast %63 : vector<1xf32> to vector<1x1x1xf32>
      %65 = vector.extract %64[0, 0, 0] : f32 from vector<1x1x1xf32>
      %66 = arith.addf %55, %65 : f32
      %c1_32 = arith.constant 1 : index
      %67 = memref.load %arg8[%c1_32] : memref<2xf32, #tpu.memory_space<smem>>
      memref.store %66, %arg8[%c1_32] : memref<2xf32, #tpu.memory_space<smem>>
    } else {
    }
    %c0_i32_13 = arith.constant 0 : i32
    %17 = arith.cmpi eq, %arg0, %c0_i32_13 : i32
    %c0_i32_14 = arith.constant 0 : i32
    %18 = arith.cmpi eq, %arg1, %c0_i32_14 : i32
    %19 = arith.andi %17, %18 : i1
    %20 = arith.extui %19 : i1 to i32
    %c0_i32_15 = arith.constant 0 : i32
    %21 = arith.cmpi ne, %20, %c0_i32_15 : i32
    scf.if %21 {
      %c0_16 = arith.constant 0 : index
      %22 = memref.load %arg8[%c0_16] : memref<2xf32, #tpu.memory_space<smem>>
      %c0_17 = arith.constant 0 : index
      %c0_18 = arith.constant 0 : index
      %23 = memref.load %arg5[%c0_17, %c0_18] : memref<1x1xf32, #tpu.memory_space<smem>>
      memref.store %22, %arg5[%c0_17, %c0_18] : memref<1x1xf32, #tpu.memory_space<smem>>
      %c1 = arith.constant 1 : index
      %24 = memref.load %arg8[%c1] : memref<2xf32, #tpu.memory_space<smem>>
      %c0_19 = arith.constant 0 : index
      %c0_20 = arith.constant 0 : index
      %25 = memref.load %arg6[%c0_19, %c0_20] : memref<1x1xf32, #tpu.memory_space<smem>>
      memref.store %24, %arg6[%c0_19, %c0_20] : memref<1x1xf32, #tpu.memory_space<smem>>
    } else {
    }
    return
  }
  func.func @transform_0(%arg0: i32, %arg1: i32) -> (i32, i32) {
    %c0_i32 = arith.constant 0 : i32
    return %arg0, %arg1 : i32, i32
  }
  func.func @transform_1(%arg0: i32, %arg1: i32) -> (i32, i32) {
    %c0_i32 = arith.constant 0 : i32
    %c0_i32_0 = arith.constant 0 : i32
    return %arg1, %c0_i32 : i32, i32
  }
  func.func @transform_2(%arg0: i32, %arg1: i32) -> (i32, i32) {
    %c0_i32 = arith.constant 0 : i32
    %c0_i32_0 = arith.constant 0 : i32
    %c0_i32_1 = arith.constant 0 : i32
    return %c0_i32, %c0_i32_0 : i32, i32
  }
  func.func @transform_3(%arg0: i32, %arg1: i32) -> (i32, i32) {
    %c0_i32 = arith.constant 0 : i32
    %c0_i32_0 = arith.constant 0 : i32
    %c0_i32_1 = arith.constant 0 : i32
    return %c0_i32, %c0_i32_0 : i32, i32
  }
  func.func @transform_4(%arg0: i32, %arg1: i32) -> (i32, i32) {
    %c0_i32 = arith.constant 0 : i32
    %c0_i32_0 = arith.constant 0 : i32
    %c0_i32_1 = arith.constant 0 : i32
    return %c0_i32, %c0_i32_0 : i32, i32
  }
}

module attributes {stable_mosaic.version = 11 : i64} {
  func.func @_final_hinge_kernel(%arg0: i32, %arg1: i32, %arg2: memref<16x384xbf16, #tpu.memory_space<vmem>>, %arg3: memref<384x128xbf16, #tpu.memory_space<vmem>>, %arg4: memref<1x128xf32, #tpu.memory_space<vmem>>, %arg5: memref<1x1xf32, #tpu.memory_space<smem>>, %arg6: memref<1x1xf32, #tpu.memory_space<smem>>, %arg7: memref<16x128xf32, #tpu.memory_space<vmem>>, %arg8: memref<2xf32, #tpu.memory_space<smem>>) attributes {dimension_semantics = [#tpu.dimension_semantics<arbitrary>, #tpu.dimension_semantics<arbitrary>], iteration_bounds = array<i64: 1, 1>, scalar_prefetch = 0 : i64, scratch_operands = 2 : i64, tpu.core_type = #tpu.core_type<tc>, window_params = [{transform_indices = @transform_0, window_bounds = array<i64: 16, 384>}, {transform_indices = @transform_1, window_bounds = array<i64: 384, 128>}, {pipeline_mode = #tpu.pipeline_mode<synchronous>, transform_indices = @transform_2, window_bounds = array<i64: 1, 128>}, {transform_indices = @transform_3, window_bounds = array<i64: 1, 1>}, {transform_indices = @transform_4, window_bounds = array<i64: 1, 1>}]} {
    %c0_i32 = arith.constant 0 : i32
    %0 = arith.cmpi eq, %arg0, %c0_i32 : i32
    %c0_i32_0 = arith.constant 0 : i32
    %1 = arith.cmpi eq, %arg1, %c0_i32_0 : i32
    %2 = arith.andi %0, %1 : i1
    %3 = arith.extui %2 : i1 to i32
    %c0_i32_1 = arith.constant 0 : i32
    %4 = arith.cmpi ne, %3, %c0_i32_1 : i32
    scf.if %4 {
      %cst_16 = arith.constant 0.000000e+00 : f32
      %c0_17 = arith.constant 0 : index
      %22 = memref.load %arg8[%c0_17] : memref<2xf32, #tpu.memory_space<smem>>
      memref.store %cst_16, %arg8[%c0_17] : memref<2xf32, #tpu.memory_space<smem>>
      %cst_18 = arith.constant 0.000000e+00 : f32
      %c1 = arith.constant 1 : index
      %23 = memref.load %arg8[%c1] : memref<2xf32, #tpu.memory_space<smem>>
      memref.store %cst_18, %arg8[%c1] : memref<2xf32, #tpu.memory_space<smem>>
    } else {
    }
    %c0_i32_2 = arith.constant 0 : i32
    %5 = arith.cmpi eq, %arg1, %c0_i32_2 : i32
    %6 = arith.extui %5 : i1 to i32
    %c0_i32_3 = arith.constant 0 : i32
    %7 = arith.cmpi ne, %6, %c0_i32_3 : i32
    scf.if %7 {
      %cst_16 = arith.constant 0.000000e+00 : f32
      %22 = vector.broadcast %cst_16 : f32 to vector<16x128xf32>
      %c0_17 = arith.constant 0 : index
      %c0_18 = arith.constant 0 : index
      %23 = vector.load %arg7[%c0_17, %c0_18] : memref<16x128xf32, #tpu.memory_space<vmem>>, vector<16x128xf32>
      tpu.vector_store %arg7[%c0_17, %c0_18], %22 {strides = array<i32>} : memref<16x128xf32, #tpu.memory_space<vmem>>, vector<16x128xf32>,
    } else {
    }
    %c0 = arith.constant 0 : index
    %c0_4 = arith.constant 0 : index
    %8 = vector.load %arg7[%c0, %c0_4] : memref<16x128xf32, #tpu.memory_space<vmem>>, vector<16x128xf32>
    %c0_5 = arith.constant 0 : index
    %c0_6 = arith.constant 0 : index
    %9 = vector.load %arg2[%c0_5, %c0_6] : memref<16x384xbf16, #tpu.memory_space<vmem>>, vector<16x384xbf16>
    %c0_7 = arith.constant 0 : index
    %c0_8 = arith.constant 0 : index
    %10 = vector.load %arg3[%c0_7, %c0_8] : memref<384x128xbf16, #tpu.memory_space<vmem>>, vector<384x128xbf16>
    %cst = arith.constant dense<0.000000e+00> : vector<16x128xf32>
    %11 = tpu.matmul %9, %10, %cst {dimension_numbers = #tpu.dot_dimension_numbers<[1], [0], [0], [1], [0, 0, 1, 1], [], []>} : vector<16x384xbf16>, vector<384x128xbf16>, vector<16x128xf32> -> vector<16x128xf32>
    %12 = arith.addf %8, %11 : vector<16x128xf32>
    %c0_9 = arith.constant 0 : index
    %c0_10 = arith.constant 0 : index
    %13 = vector.load %arg7[%c0_9, %c0_10] : memref<16x128xf32, #tpu.memory_space<vmem>>, vector<16x128xf32>
    tpu.vector_store %arg7[%c0_9, %c0_10], %12 {strides = array<i32>} : memref<16x128xf32, #tpu.memory_space<vmem>>, vector<16x128xf32>,
    %c0_i32_11 = arith.constant 0 : i32
    %14 = arith.cmpi eq, %arg1, %c0_i32_11 : i32
    %15 = arith.extui %14 : i1 to i32
    %c0_i32_12 = arith.constant 0 : i32
    %16 = arith.cmpi ne, %15, %c0_i32_12 : i32
    scf.if %16 {
      %c0_16 = arith.constant 0 : index
      %c0_17 = arith.constant 0 : index
      %22 = vector.load %arg7[%c0_16, %c0_17] : memref<16x128xf32, #tpu.memory_space<vmem>>, vector<16x128xf32>
      %c0_18 = arith.constant 0 : index
      %c0_19 = arith.constant 0 : index
      %23 = vector.load %arg4[%c0_18, %c0_19] : memref<1x128xf32, #tpu.memory_space<vmem>>, vector<1x128xf32>
      %24 = vector.broadcast %23 : vector<1x128xf32> to vector<16x128xf32>
      %25 = arith.addf %22, %24 : vector<16x128xf32>
      %26 = tpu.iota {dimensions = array<i32: 0>} : vector<16x128xi32>
      %c16_i32 = arith.constant 16 : i32
      %27 = arith.muli %arg0, %c16_i32 : i32
      %28 = vector.broadcast %27 : i32 to vector<16x128xi32>
      %29 = arith.addi %26, %28 : vector<16x128xi32>
      %30 = tpu.iota {dimensions = array<i32: 1>} : vector<16x128xi32>
      %c0_i32_20 = arith.constant 0 : i32
      %31 = vector.broadcast %c0_i32_20 : i32 to vector<16x128xi32>
      %32 = arith.cmpi eq, %30, %31 : vector<16x128xi32>
      %c8_i32 = arith.constant 8 : i32
      %33 = vector.broadcast %c8_i32 : i32 to vector<16x128xi32>
      %34 = arith.cmpi slt, %29, %33 : vector<16x128xi32>
      %35 = arith.andi %32, %34 : vector<16x128xi1>
      %c8_i32_21 = arith.constant 8 : i32
      %36 = vector.broadcast %c8_i32_21 : i32 to vector<16x128xi32>
      %37 = arith.cmpi sge, %29, %36 : vector<16x128xi32>
      %c16_i32_22 = arith.constant 16 : i32
      %38 = vector.broadcast %c16_i32_22 : i32 to vector<16x128xi32>
      %39 = arith.cmpi slt, %29, %38 : vector<16x128xi32>
      %40 = arith.andi %37, %39 : vector<16x128xi1>
      %41 = arith.andi %32, %40 : vector<16x128xi1>
      %c0_23 = arith.constant 0 : index
      %42 = memref.load %arg8[%c0_23] : memref<2xf32, #tpu.memory_space<smem>>
      %cst_24 = arith.constant 1.000000e+00 : f32
      %43 = vector.broadcast %cst_24 : f32 to vector<16x128xf32>
      %44 = arith.subf %43, %25 : vector<16x128xf32>
      %cst_25 = arith.constant 0.000000e+00 : f32
      %45 = vector.broadcast %cst_25 : f32 to vector<16x128xf32>
      %46 = arith.maximumf %44, %45 : vector<16x128xf32>
      %cst_26 = arith.constant 0.000000e+00 : f32
      %47 = vector.broadcast %cst_26 : f32 to vector<16x128xf32>
      %48 = arith.select %35, %46, %47 : vector<16x128xi1>, vector<16x128xf32>
      %49 = vector.shape_cast %48 : vector<16x128xf32> to vector<1x16x128xf32>
      %cst_27 = arith.constant dense<0.000000e+00> : vector<1xf32>
      %50 = vector.multi_reduction <add>, %49, %cst_27 [1, 2] : vector<1x16x128xf32> to vector<1xf32>
      %51 = vector.shape_cast %50 : vector<1xf32> to vector<1x1x1xf32>
      %52 = vector.extract %51[0, 0, 0] : f32 from vector<1x1x1xf32>
      %53 = arith.addf %42, %52 : f32
      %c0_28 = arith.constant 0 : index
      %54 = memref.load %arg8[%c0_28] : memref<2xf32, #tpu.memory_space<smem>>
      memref.store %53, %arg8[%c0_28] : memref<2xf32, #tpu.memory_space<smem>>
      %c1 = arith.constant 1 : index
      %55 = memref.load %arg8[%c1] : memref<2xf32, #tpu.memory_space<smem>>
      %cst_29 = arith.constant 1.000000e+00 : f32
      %56 = vector.broadcast %cst_29 : f32 to vector<16x128xf32>
      %57 = arith.addf %56, %25 : vector<16x128xf32>
      %cst_30 = arith.constant 0.000000e+00 : f32
      %58 = vector.broadcast %cst_30 : f32 to vector<16x128xf32>
      %59 = arith.maximumf %57, %58 : vector<16x128xf32>
      %cst_31 = arith.constant 0.000000e+00 : f32
      %60 = vector.broadcast %cst_31 : f32 to vector<16x128xf32>
      %61 = arith.select %41, %59, %60 : vector<16x128xi1>, vector<16x128xf32>
      %62 = vector.shape_cast %61 : vector<16x128xf32> to vector<1x16x128xf32>
      %cst_32 = arith.constant dense<0.000000e+00> : vector<1xf32>
      %63 = vector.multi_reduction <add>, %62, %cst_32 [1, 2] : vector<1x16x128xf32> to vector<1xf32>
      %64 = vector.shape_cast %63 : vector<1xf32> to vector<1x1x1xf32>
      %65 = vector.extract %64[0, 0, 0] : f32 from vector<1x1x1xf32>
      %66 = arith.addf %55, %65 : f32
      %c1_33 = arith.constant 1 : index
      %67 = memref.load %arg8[%c1_33] : memref<2xf32, #tpu.memory_space<smem>>
      memref.store %66, %arg8[%c1_33] : memref<2xf32, #tpu.memory_space<smem>>
    } else {
    }
    %c0_i32_13 = arith.constant 0 : i32
    %17 = arith.cmpi eq, %arg0, %c0_i32_13 : i32
    %c0_i32_14 = arith.constant 0 : i32
    %18 = arith.cmpi eq, %arg1, %c0_i32_14 : i32
    %19 = arith.andi %17, %18 : i1
    %20 = arith.extui %19 : i1 to i32
    %c0_i32_15 = arith.constant 0 : i32
    %21 = arith.cmpi ne, %20, %c0_i32_15 : i32
    scf.if %21 {
      %c0_16 = arith.constant 0 : index
      %22 = memref.load %arg8[%c0_16] : memref<2xf32, #tpu.memory_space<smem>>
      %c0_17 = arith.constant 0 : index
      %c0_18 = arith.constant 0 : index
      %23 = memref.load %arg5[%c0_17, %c0_18] : memref<1x1xf32, #tpu.memory_space<smem>>
      memref.store %22, %arg5[%c0_17, %c0_18] : memref<1x1xf32, #tpu.memory_space<smem>>
      %c1 = arith.constant 1 : index
      %24 = memref.load %arg8[%c1] : memref<2xf32, #tpu.memory_space<smem>>
      %c0_19 = arith.constant 0 : index
      %c0_20 = arith.constant 0 : index
      %25 = memref.load %arg6[%c0_19, %c0_20] : memref<1x1xf32, #tpu.memory_space<smem>>
      memref.store %24, %arg6[%c0_19, %c0_20] : memref<1x1xf32, #tpu.memory_space<smem>>
    } else {
    }
    return
  }
  func.func @transform_0(%arg0: i32, %arg1: i32) -> (i32, i32) {
    %c0_i32 = arith.constant 0 : i32
    return %arg0, %arg1 : i32, i32
  }
  func.func @transform_1(%arg0: i32, %arg1: i32) -> (i32, i32) {
    %c0_i32 = arith.constant 0 : i32
    %c0_i32_0 = arith.constant 0 : i32
    return %arg1, %c0_i32 : i32, i32
  }
  func.func @transform_2(%arg0: i32, %arg1: i32) -> (i32, i32) {
    %c0_i32 = arith.constant 0 : i32
    %c0_i32_0 = arith.constant 0 : i32
    %c0_i32_1 = arith.constant 0 : i32
    return %c0_i32, %c0_i32_0 : i32, i32
  }
  func.func @transform_3(%arg0: i32, %arg1: i32) -> (i32, i32) {
    %c0_i32 = arith.constant 0 : i32
    %c0_i32_0 = arith.constant 0 : i32
    %c0_i32_1 = arith.constant 0 : i32
    return %c0_i32, %c0_i32_0 : i32, i32
  }
  func.func @transform_4(%arg0: i32, %arg1: i32) -> (i32, i32) {
    %c0_i32 = arith.constant 0 : i32
    %c0_i32_0 = arith.constant 0 : i32
    %c0_i32_1 = arith.constant 0 : i32
    return %c0_i32, %c0_i32_0 : i32, i32
  }
}

</mosaic_0001>

<bundles_post_ra>
// kernel: gan_loss_forward.9
= control target key start
LH: loop header
LB: loop body
LE: loop exit
PB: predicated region body
PF: predicated region fallthrough
CT: control target
= control target key end

     0   :  { %s879_s12 = smov 0   ;;  %s881_s13 = smov 0   ;;  %s989_s0 = inlined_call_operand.vmem [shape: bf16[256,128], index: 0, kind: input, shape index: {}]   ;;  %s990_s1 = inlined_call_operand.vmem [shape: bf16[128,128], index: 1, kind: input, shape index: {}]   ;;  %s991_s2 = inlined_call_operand.vmem [shape: f32[1,128], index: 2, kind: input, shape index: {}]   ;;  %s992_s3 = inlined_call_operand.vmem [shape: f32[256,128], index: 3, kind: output, shape index: {}]  }
   0x1   :  { %s883_s14 = smov 0  }
   0x2 LB: > { %s25_s15 = sadd.s32 1, %s853_s13  ;;  %p707_p0 = scmp.ge.s32.totalorder %s857_s14, 1  ;;  %s857_s14 = sphi %s883_s14, %s13_s14   ;;  %s853_s13 = sphi %s881_s13, %s994_s13   ;;  %s849_s12 = sphi %s879_s12, %s993_s12  }
   0x3   : > { %p27_p1 = scmp.ge.s32.totalorder %s25_s15, 2  ;;  %p166_p2 = scmp.lt.s32.totalorder %s857_s14, 3 }
   0x5   : > { %s996_s15 = smov (%p27_p1, %s25_s15), 0  ;;  %p167_p3 = pnand %p707_p0, %p166_p2 }
   0x6   : > { %v819_v0 = vld [vmem:[%s990_s1] sm:$0xff] (!%p167_p3)   ;;  %s708_s18 = sshll.u32 (!%p167_p3), %s849_s12, 4  ;;  %v820_v1 = vld [vmem:[%s990_s1 + $0x8] sm:$0xff] (!%p167_p3)   ;;  %v821_v2 = vld [vmem:[%s990_s1 + $0x10] sm:$0xff] (!%p167_p3)  }
   0x7   : > { %170 = sbr.rel (%p167_p3) target bundleno = 271 (0x10f), region = 32  ;;  %p199_p4 = scmp.lt.s32.totalorder (!%p167_p3), %s708_s18, 31  ;;  %747 = vmatprep.subr.bf16.mxu0 (!%p167_p3), %v819_v0  ;;  %779 = vmatprep.subr.bf16.mxu1 (!%p167_p3), %v819_v0  ;;  %v822_v3 = vld [vmem:[%s990_s1 + $0x18] sm:$0xff] (!%p167_p3)   ;;  %v823_v6 = vld [vmem:[%s990_s1 + $0x20] sm:$0xff] (!%p167_p3)   ;;  %v824_v7 = vld [vmem:[%s990_s1 + $0x28] sm:$0xff] (!%p167_p3)  }
   0x8   : > { %748 = vmatpush3.bf16.msra.mxu0 (!%p167_p3), %v819_v0  ;;  %787 = vmatpush3.bf16.msra.mxu1 (!%p167_p3), %v819_v0  ;;  %v825_v8 = vld [vmem:[%s990_s1 + $0x30] sm:$0xff] (!%p167_p3)   ;;  %v826_v9 = vld [vmem:[%s990_s1 + $0x38] sm:$0xff] (!%p167_p3)   ;;  %v940_v16 = vld [vmem:[%s991_s2] ss:$0 sm:$0xff] (!%p167_p3) }
   0x9   : > { %749 = vmatprep.subr.bf16.mxu0 (!%p167_p3), %v820_v1  ;;  %780 = vmatprep.subr.bf16.mxu1 (!%p167_p3), %v820_v1 }
   0xc   : > { %750 = vmatpush3.bf16.msra.mxu0 (!%p167_p3), %v820_v1  ;;  %788 = vmatpush3.bf16.msra.mxu1 (!%p167_p3), %v820_v1 }
   0xd   : > { %751 = vmatprep.subr.bf16.mxu0 (!%p167_p3), %v821_v2  ;;  %781 = vmatprep.subr.bf16.mxu1 (!%p167_p3), %v821_v2 }
   0xe   : > { %s998_s18 = smov (!%p199_p4, %s708_s18), 31 }
   0xf   : > { %s709_s23 = sshll.u32 %s998_s18, 2  ;;  %s711_s12 = sshll.u32 %s998_s18, 3 }
  0x10   : > { %s912_s26 = scalar_lea.vmem %s989_s0, %s709_s23  ;;  %752 = vmatpush3.bf16.msra.mxu0 %v821_v2  ;;  %789 = vmatpush3.bf16.msra.mxu1 %v821_v2  ;;  %s950_s19 = scalar_lea.vmem %s992_s3, %s711_s12 }
  0x11   : > { %v827_v4 = vld [vmem:[%s912_s26] sm:$0xff]   ;;  %753 = vmatprep.subr.bf16.mxu0 %v822_v3  ;;  %782 = vmatprep.subr.bf16.mxu1 %v822_v3  ;;  %v829_v10 = vld [vmem:[%s912_s26 + $0x8] sm:$0xff]   ;;  %v831_v12 = vld [vmem:[%s912_s26 + $0x10] sm:$0xff]  }
  0x12   : > { %v828_v5 = vld [vmem:[%s912_s26 + $0x20] sm:$0xff]   ;;  %763 = vmatprep.mubr.bf16.mxu0 %v827_v4  ;;  %v830_v11 = vld [vmem:[%s912_s26 + $0x28] sm:$0xff]   ;;  %v832_v13 = vld [vmem:[%s912_s26 + $0x30] sm:$0xff]  }
  0x13   : > { %771 = vmatprep.mubr.bf16.mxu1 %v828_v5  ;;  %v833_v14 = vld [vmem:[%s912_s26 + $0x18] sm:$0xff]  }
  0x14   : > { %754 = vmatpush3.bf16.msra.mxu0 %v822_v3  ;;  %790 = vmatpush3.bf16.msra.mxu1 %v822_v3  ;;  %v834_v15 = vld [vmem:[%s912_s26 + $0x38] sm:$0xff]  }
  0x15   : > { %755 = vmatprep.subr.bf16.mxu0 %v823_v6  ;;  %783 = vmatprep.subr.bf16.mxu1 %v823_v6 }
  0x18   : > { %756 = vmatpush3.bf16.msra.mxu0 %v823_v6  ;;  %791 = vmatpush3.bf16.msra.mxu1 %v823_v6 }
  0x19   : > { %757 = vmatprep.subr.bf16.mxu0 %v824_v7  ;;  %784 = vmatprep.subr.bf16.mxu1 %v824_v7 }
  0x1c   : > { %758 = vmatpush3.bf16.msra.mxu0 %v824_v7  ;;  %792 = vmatpush3.bf16.msra.mxu1 %v824_v7 }
  0x1d   : > { %759 = vmatprep.subr.bf16.mxu0 %v825_v8  ;;  %785 = vmatprep.subr.bf16.mxu1 %v825_v8 }
  0x20   : > { %760 = vmatpush3.bf16.msra.mxu0 %v825_v8  ;;  %793 = vmatpush3.bf16.msra.mxu1 %v825_v8 }
  0x21   : > { %761 = vmatprep.subr.bf16.mxu0 %v826_v9  ;;  %786 = vmatprep.subr.bf16.mxu1 %v826_v9 }
  0x24   : > { %762 = vmatpush3.bf16.msra.mxu0 %v826_v9  ;;  %794 = vmatpush3.bf16.msra.mxu1 %v826_v9 }
  0x27   : > { %764 = vmatmul.mubr.bf16.vlgmr.msra.gmra.mrb[0].mxu0 %v829_v10  ;;  %772 = vmatmul.mubr.bf16.vlgmr.msra.gmra.mrb[0].mxu1 %v830_v11 }
  0x28   : > { %767 = vmatprep.mubr.bf16.mxu0 %v831_v12  ;;  %775 = vmatprep.mubr.bf16.mxu1 %v832_v13 }
  0x2f   : > { %768 = vmatmul.mubr.bf16.gmra.mrb[4].mxu0 %v833_v14  ;;  %776 = vmatmul.mubr.bf16.gmra.mrb[4].mxu1 %v834_v15 }
  0xfa   : > { %v765_v17 = vpop.f32.mrb[0].mxu0  ;;  %v773_v18 = vpop.f32.mrb[0].mxu1 }
  0xfb   : > { %v541_v19 = vadd.f32 %v765_v17, %v940_v16  ;;  %v549_v20 = vadd.f32 %v773_v18, %v940_v16  ;;  %v418_v21 = vpop.f32.mrb[1].mxu0  ;;  %v450_v22 = vpop.f32.mrb[1].mxu1 }
  0xfc   : > { %v539_v23 = vadd.f32 %v940_v16, %v418_v21  ;;  %v547_v24 = vadd.f32 %v940_v16, %v450_v22  ;;  %v766_v25 = vpop.f32.mrb[2].mxu0  ;;  %v774_v26 = vpop.f32.mrb[2].mxu1 }
  0xfd   : > { %vm557_vm0 = vcmp.ge.f32.partialorder %v541_v19, 0.0  ;;  %v573_v27 = vmul.f32 0.2, %v541_v19  ;;  %vm565_vm1 = vcmp.ge.f32.partialorder %v549_v20, 0.0  ;;  %v581_v28 = vmul.f32 0.2, %v549_v20 }
  0xfe   : > { %vm555_vm2 = vcmp.ge.f32.partialorder %v539_v23, 0.0  ;;  %v571_v29 = vmul.f32 0.2, %v539_v23  ;;  %vm563_vm3 = vcmp.ge.f32.partialorder %v547_v24, 0.0  ;;  %v579_v30 = vmul.f32 0.2, %v547_v24 }
  0xff   : > { %v589_v31 = vsel %vm557_vm0, %v541_v19, %v573_v27  ;;  %v597_v32 = vsel %vm565_vm1, %v549_v20, %v581_v28  ;;  %v542_v33 = vadd.f32 %v766_v25, %v940_v16  ;;  %v550_v34 = vadd.f32 %v774_v26, %v940_v16  ;;  %v421_v35 = vpop.f32.mrb[3].mxu0  ;;  %v453_v36 = vpop.f32.mrb[3].mxu1 }
 0x100   : > { %605 = vst [vmem:[%s950_s19 + $0x10] sm:$0xff] %v589_v31  ;;  %613 = vst [vmem:[%s950_s19 + $0x50] sm:$0xff] %v597_v32  ;;  %v587_v37 = vsel %vm555_vm2, %v539_v23, %v571_v29  ;;  %v595_v38 = vsel %vm563_vm3, %v547_v24, %v579_v30  ;;  %v540_v39 = vadd.f32 %v940_v16, %v421_v35 }
 0x101   : > { %v548_v40 = vadd.f32 %v940_v16, %v453_v36  ;;  %603 = vst [vmem:[%s950_s19] sm:$0xff] %v587_v37  ;;  %611 = vst [vmem:[%s950_s19 + $0x40] sm:$0xff] %v595_v38  ;;  %vm558_vm4 = vcmp.ge.f32.partialorder %v542_v33, 0.0  ;;  %v574_v41 = vmul.f32 0.2, %v542_v33  ;;  %vm566_vm5 = vcmp.ge.f32.partialorder %v550_v34, 0.0 }
 0x102   : > { %v582_v42 = vmul.f32 0.2, %v550_v34  ;;  %vm556_vm6 = vcmp.ge.f32.partialorder %v540_v39, 0.0  ;;  %v572_v43 = vmul.f32 0.2, %v540_v39  ;;  %v769_v47 = vpop.f32.mrb[4].mxu0 }
 0x103   : > { %vm564_vm7 = vcmp.ge.f32.partialorder %v548_v40, 0.0  ;;  %v580_v44 = vmul.f32 0.2, %v548_v40  ;;  %v590_v45 = vsel %vm558_vm4, %v542_v33, %v574_v41  ;;  %v777_v48 = vpop.f32.mrb[4].mxu1  ;;  %v545_v51 = vadd.f32 %v769_v47, %v940_v16  ;;  %v434_v53 = vpop.f32.mrb[5].mxu0 }
 0x104   : > { %v598_v46 = vsel %vm566_vm5, %v550_v34, %v582_v42  ;;  %606 = vst [vmem:[%s950_s19 + $0x18] sm:$0xff] %v590_v45  ;;  %v588_v49 = vsel %vm556_vm6, %v540_v39, %v572_v43  ;;  %v553_v52 = vadd.f32 %v777_v48, %v940_v16  ;;  %v466_v54 = vpop.f32.mrb[5].mxu1  ;;  %v543_v55 = vadd.f32 %v940_v16, %v434_v53  ;;  %v770_v57 = vpop.f32.mrb[6].mxu0 }
 0x105   : > { %614 = vst [vmem:[%s950_s19 + $0x58] sm:$0xff] %v598_v46  ;;  %v596_v50 = vsel %vm564_vm7, %v548_v40, %v580_v44  ;;  %604 = vst [vmem:[%s950_s19 + $0x8] sm:$0xff] %v588_v49  ;;  %v551_v56 = vadd.f32 %v940_v16, %v466_v54  ;;  %v778_v58 = vpop.f32.mrb[6].mxu1  ;;  %vm561_vm8 = vcmp.ge.f32.partialorder %v545_v51, 0.0  ;;  %v577_v59 = vmul.f32 0.2, %v545_v51 }
 0x106   : > { %612 = vst [vmem:[%s950_s19 + $0x48] sm:$0xff] %v596_v50  ;;  %vm569_vm9 = vcmp.ge.f32.partialorder %v553_v52, 0.0  ;;  %v585_v60 = vmul.f32 0.2, %v553_v52  ;;  %vm559_vm10 = vcmp.ge.f32.partialorder %v543_v55, 0.0  ;;  %v546_v1 = vadd.f32 %v770_v57, %v940_v16  ;;  %v437_v3 = vpop.f32.mrb[7].mxu0 }
 0x107   : > { %v575_v61 = vmul.f32 0.2, %v543_v55  ;;  %vm567_vm11 = vcmp.ge.f32.partialorder %v551_v56, 0.0  ;;  %v583_v62 = vmul.f32 0.2, %v551_v56  ;;  %v593_v63 = vsel %vm561_vm8, %v545_v51, %v577_v59  ;;  %v469_v4 = vpop.f32.mrb[7].mxu1 }
 0x108   : > { %v601_v0 = vsel %vm569_vm9, %v553_v52, %v585_v60  ;;  %v554_v2 = vadd.f32 %v778_v58, %v940_v16  ;;  %609 = vst [vmem:[%s950_s19 + $0x30] sm:$0xff] %v593_v63  ;;  %v544_v7 = vadd.f32 %v940_v16, %v437_v3  ;;  %v552_v8 = vadd.f32 %v940_v16, %v469_v4 }
 0x109   : > { %617 = vst [vmem:[%s950_s19 + $0x70] sm:$0xff] %v601_v0  ;;  %v591_v5 = vsel %vm559_vm10, %v543_v55, %v575_v61  ;;  %v599_v6 = vsel %vm567_vm11, %v551_v56, %v583_v62  ;;  %vm562_vm12 = vcmp.ge.f32.partialorder %v546_v1, 0.0  ;;  %v578_v9 = vmul.f32 0.2, %v546_v1 }
 0x10a   : > { %607 = vst [vmem:[%s950_s19 + $0x20] sm:$0xff] %v591_v5  ;;  %615 = vst [vmem:[%s950_s19 + $0x60] sm:$0xff] %v599_v6  ;;  %vm570_vm13 = vcmp.ge.f32.partialorder %v554_v2, 0.0  ;;  %v586_v10 = vmul.f32 0.2, %v554_v2  ;;  %vm560_vm14 = vcmp.ge.f32.partialorder %v544_v7, 0.0 }
 0x10b   : > { %v576_v11 = vmul.f32 0.2, %v544_v7  ;;  %vm568_vm15 = vcmp.ge.f32.partialorder %v552_v8, 0.0  ;;  %v584_v12 = vmul.f32 0.2, %v552_v8  ;;  %v594_v13 = vsel %vm562_vm12, %v546_v1, %v578_v9 }
 0x10c   : > { %v602_v14 = vsel %vm570_vm13, %v554_v2, %v586_v10  ;;  %610 = vst [vmem:[%s950_s19 + $0x38] sm:$0xff] %v594_v13 }
 0x10d   : > { %618 = vst [vmem:[%s950_s19 + $0x78] sm:$0xff] %v602_v14  ;;  %v592_v15 = vsel %vm560_vm14, %v544_v7, %v576_v11  ;;  %v600_v17 = vsel %vm568_vm15, %v552_v8, %v584_v12 }
 0x10e   : > { %608 = vst [vmem:[%s950_s19 + $0x28] sm:$0xff] %v592_v15  ;;  %616 = vst [vmem:[%s950_s19 + $0x68] sm:$0xff] %v600_v17 }
 0x10f PF: > { %s13_s14 = sadd.s32 1, %s857_s14   ;;  %s993_s12 = smov %s853_s13 }
 0x110   : > { %p10_p5 = scmp.ge.s32.totalorder %s13_s14, 4   ;;  %s994_s13 = smov %s996_s15 }
 0x112   :  { %12 = sbr.rel (!%p10_p5) target bundleno = 2 (0x2), region = 73 }

// kernel: gan_loss_forward.10
= control target key start
LH: loop header
LB: loop body
LE: loop exit
PB: predicated region body
PF: predicated region fallthrough
CT: control target
= control target key end

     0   :  { %s434_s1 = inlined_call_operand.vmem [shape: bf16[128,128], index: 1, kind: input, shape index: {}]   ;;  %s435_s0 = inlined_call_operand.vmem [shape: bf16[64,128], index: 0, kind: input, shape index: {}]   ;;  %s436_s2 = inlined_call_operand.vmem [shape: f32[1,128], index: 2, kind: input, shape index: {}]   ;;  %s437_s3 = inlined_call_operand.vmem [shape: f32[64,128], index: 3, kind: output, shape index: {}]  }
   0x1   :  { %v339_v0 = vld [vmem:[%s434_s1] sm:$0xff]   ;;  %v340_v1 = vld [vmem:[%s434_s1 + $0x8] sm:$0xff]   ;;  %v341_v2 = vld [vmem:[%s434_s1 + $0x10] sm:$0xff]  }
   0x2   :  { %299 = vmatprep.subr.bf16.mxu0 %v339_v0  ;;  %323 = vmatprep.subr.bf16.mxu1 %v339_v0  ;;  %v342_v3 = vld [vmem:[%s434_s1 + $0x18] sm:$0xff]   ;;  %v347_v4 = vld [vmem:[%s435_s0] sm:$0xff]   ;;  %v348_v5 = vld [vmem:[%s435_s0 + $0x10] sm:$0xff]  }
   0x3   :  { %300 = vmatpush3.bf16.msra.mxu0 %v339_v0  ;;  %331 = vmatpush3.bf16.msra.mxu1 %v339_v0  ;;  %v343_v6 = vld [vmem:[%s434_s1 + $0x20] sm:$0xff]   ;;  %v344_v7 = vld [vmem:[%s434_s1 + $0x28] sm:$0xff]   ;;  %v345_v8 = vld [vmem:[%s434_s1 + $0x30] sm:$0xff]  }
   0x4   :  { %301 = vmatprep.subr.bf16.mxu0 %v340_v1  ;;  %324 = vmatprep.subr.bf16.mxu1 %v340_v1  ;;  %v346_v9 = vld [vmem:[%s434_s1 + $0x38] sm:$0xff]   ;;  %v349_v10 = vld [vmem:[%s435_s0 + $0x8] sm:$0xff]   ;;  %v286_v12 = vld [vmem:[%s436_s2] ss:$0 sm:$0xff] }
   0x5   :  { %315 = vmatprep.mubr.bf16.mxu0 %v347_v4  ;;  %319 = vmatprep.mubr.bf16.mxu1 %v348_v5  ;;  %v350_v11 = vld [vmem:[%s435_s0 + $0x18] sm:$0xff]  }
   0x7   :  { %302 = vmatpush3.bf16.msra.mxu0 %v340_v1  ;;  %332 = vmatpush3.bf16.msra.mxu1 %v340_v1 }
   0x8   :  { %303 = vmatprep.subr.bf16.mxu0 %v341_v2  ;;  %325 = vmatprep.subr.bf16.mxu1 %v341_v2 }
   0xb   :  { %304 = vmatpush3.bf16.msra.mxu0 %v341_v2  ;;  %333 = vmatpush3.bf16.msra.mxu1 %v341_v2 }
   0xc   :  { %305 = vmatprep.subr.bf16.mxu0 %v342_v3  ;;  %326 = vmatprep.subr.bf16.mxu1 %v342_v3 }
   0xf   :  { %306 = vmatpush3.bf16.msra.mxu0 %v342_v3  ;;  %334 = vmatpush3.bf16.msra.mxu1 %v342_v3 }
  0x10   :  { %307 = vmatprep.subr.bf16.mxu0 %v343_v6  ;;  %327 = vmatprep.subr.bf16.mxu1 %v343_v6 }
  0x13   :  { %308 = vmatpush3.bf16.msra.mxu0 %v343_v6  ;;  %335 = vmatpush3.bf16.msra.mxu1 %v343_v6 }
  0x14   :  { %309 = vmatprep.subr.bf16.mxu0 %v344_v7  ;;  %328 = vmatprep.subr.bf16.mxu1 %v344_v7 }
  0x17   :  { %310 = vmatpush3.bf16.msra.mxu0 %v344_v7  ;;  %336 = vmatpush3.bf16.msra.mxu1 %v344_v7 }
  0x18   :  { %311 = vmatprep.subr.bf16.mxu0 %v345_v8  ;;  %329 = vmatprep.subr.bf16.mxu1 %v345_v8 }
  0x1b   :  { %312 = vmatpush3.bf16.msra.mxu0 %v345_v8  ;;  %337 = vmatpush3.bf16.msra.mxu1 %v345_v8 }
  0x1c   :  { %313 = vmatprep.subr.bf16.mxu0 %v346_v9  ;;  %330 = vmatprep.subr.bf16.mxu1 %v346_v9 }
  0x1f   :  { %314 = vmatpush3.bf16.msra.mxu0 %v346_v9  ;;  %338 = vmatpush3.bf16.msra.mxu1 %v346_v9 }
  0x22   :  { %316 = vmatmul.mubr.bf16.vlgmr.msra.gmra.mrb[0].mxu0 %v349_v10  ;;  %320 = vmatmul.mubr.bf16.vlgmr.msra.gmra.mrb[0].mxu1 %v350_v11 }
  0xf5   :  { %v317_v13 = vpop.f32.mrb[0].mxu0  ;;  %v321_v14 = vpop.f32.mrb[0].mxu1 }
  0xf6   :  { %v232_v15 = vadd.f32 %v317_v13, %v286_v12  ;;  %v236_v16 = vadd.f32 %v321_v14, %v286_v12  ;;  %v165_v17 = vpop.f32.mrb[1].mxu0  ;;  %v181_v18 = vpop.f32.mrb[1].mxu1 }
  0xf7   :  { %v230_v19 = vadd.f32 %v286_v12, %v165_v17  ;;  %v234_v20 = vadd.f32 %v286_v12, %v181_v18  ;;  %v318_v21 = vpop.f32.mrb[2].mxu0  ;;  %v322_v22 = vpop.f32.mrb[2].mxu1 }
  0xf8   :  { %vm240_vm0 = vcmp.ge.f32.partialorder %v232_v15, 0.0  ;;  %v248_v23 = vmul.f32 0.2, %v232_v15  ;;  %vm244_vm1 = vcmp.ge.f32.partialorder %v236_v16, 0.0  ;;  %v252_v24 = vmul.f32 0.2, %v236_v16 }
  0xf9   :  { %vm238_vm2 = vcmp.ge.f32.partialorder %v230_v19, 0.0  ;;  %v246_v25 = vmul.f32 0.2, %v230_v19  ;;  %vm242_vm3 = vcmp.ge.f32.partialorder %v234_v20, 0.0  ;;  %v250_v26 = vmul.f32 0.2, %v234_v20 }
  0xfa   :  { %v256_v27 = vsel %vm240_vm0, %v232_v15, %v248_v23  ;;  %v260_v28 = vsel %vm244_vm1, %v236_v16, %v252_v24  ;;  %v233_v29 = vadd.f32 %v318_v21, %v286_v12  ;;  %v237_v30 = vadd.f32 %v322_v22, %v286_v12  ;;  %v168_v31 = vpop.f32.mrb[3].mxu0  ;;  %v184_v32 = vpop.f32.mrb[3].mxu1 }
  0xfb   :  { %264 = vst [vmem:[%s437_s3 + $0x10] sm:$0xff] %v256_v27  ;;  %268 = vst [vmem:[%s437_s3 + $0x30] sm:$0xff] %v260_v28  ;;  %v254_v33 = vsel %vm238_vm2, %v230_v19, %v246_v25  ;;  %v258_v34 = vsel %vm242_vm3, %v234_v20, %v250_v26  ;;  %v231_v35 = vadd.f32 %v286_v12, %v168_v31 }
  0xfc   :  { %v235_v36 = vadd.f32 %v286_v12, %v184_v32  ;;  %262 = vst [vmem:[%s437_s3] sm:$0xff] %v254_v33  ;;  %266 = vst [vmem:[%s437_s3 + $0x20] sm:$0xff] %v258_v34  ;;  %vm241_vm4 = vcmp.ge.f32.partialorder %v233_v29, 0.0  ;;  %v249_v37 = vmul.f32 0.2, %v233_v29  ;;  %vm245_vm5 = vcmp.ge.f32.partialorder %v237_v30, 0.0 }
  0xfd   :  { %v253_v38 = vmul.f32 0.2, %v237_v30  ;;  %vm239_vm6 = vcmp.ge.f32.partialorder %v231_v35, 0.0  ;;  %v247_v39 = vmul.f32 0.2, %v231_v35 }
  0xfe   :  { %vm243_vm7 = vcmp.ge.f32.partialorder %v235_v36, 0.0  ;;  %v251_v40 = vmul.f32 0.2, %v235_v36  ;;  %v257_v41 = vsel %vm241_vm4, %v233_v29, %v249_v37 }
  0xff   :  { %v261_v42 = vsel %vm245_vm5, %v237_v30, %v253_v38  ;;  %265 = vst [vmem:[%s437_s3 + $0x18] sm:$0xff] %v257_v41  ;;  %v255_v43 = vsel %vm239_vm6, %v231_v35, %v247_v39 }
 0x100   :  { %269 = vst [vmem:[%s437_s3 + $0x38] sm:$0xff] %v261_v42  ;;  %v259_v44 = vsel %vm243_vm7, %v235_v36, %v251_v40  ;;  %263 = vst [vmem:[%s437_s3 + $0x8] sm:$0xff] %v255_v43 }
 0x101   :  { %267 = vst [vmem:[%s437_s3 + $0x28] sm:$0xff] %v259_v44 }

// kernel: gan_loss_forward.11
= control target key start
LH: loop header
LB: loop body
LE: loop exit
PB: predicated region body
PF: predicated region fallthrough
CT: control target
= control target key end

     0   :  { %s377_s1 = inlined_call_operand.vmem [shape: bf16[256,128], index: 1, kind: input, shape index: {}]   ;;  %s378_s0 = inlined_call_operand.vmem [shape: bf16[16,256], index: 0, kind: input, shape index: {}]   ;;  %s379_s2 = inlined_call_operand.vmem [shape: f32[1,128], index: 2, kind: input, shape index: {}]   ;;  %s380_s3 = inlined_call_operand.vmem [shape: f32[16,128], index: 3, kind: output, shape index: {}]  }
   0x1   :  { %v275_v0 = vld [vmem:[%s377_s1 + $0x40] sm:$0xff]   ;;  %v277_v2 = vld [vmem:[%s377_s1 + $0x48] sm:$0xff]   ;;  %v279_v4 = vld [vmem:[%s377_s1 + $0x50] sm:$0xff]  }
   0x2   :  { %v276_v1 = vld [vmem:[%s377_s1] sm:$0xff]   ;;  %253 = vmatprep.subr.bf16.mxu0 %v275_v0  ;;  %v278_v3 = vld [vmem:[%s377_s1 + $0x8] sm:$0xff]   ;;  %v280_v5 = vld [vmem:[%s377_s1 + $0x10] sm:$0xff]  }
   0x3   :  { %254 = vmatpush3.bf16.msra.mxu0 %v276_v1  ;;  %v281_v6 = vld [vmem:[%s377_s1 + $0x58] sm:$0xff]   ;;  %v283_v8 = vld [vmem:[%s377_s1 + $0x60] sm:$0xff]   ;;  %v285_v10 = vld [vmem:[%s377_s1 + $0x68] sm:$0xff]  }
   0x4   :  { %255 = vmatprep.subr.bf16.mxu0 %v277_v2  ;;  %v282_v7 = vld [vmem:[%s377_s1 + $0x18] sm:$0xff]   ;;  %v284_v9 = vld [vmem:[%s377_s1 + $0x20] sm:$0xff]   ;;  %v286_v12 = vld [vmem:[%s377_s1 + $0x28] sm:$0xff]  }
   0x5   :  { %v293_v11 = vld [vmem:[%s378_s0 + $0x4] ss:$8 sps:$4 sm:$0xff]   ;;  %v287_v13 = vld [vmem:[%s377_s1 + $0x70] sm:$0xff]   ;;  %v289_v15 = vld [vmem:[%s377_s1 + $0x78] sm:$0xff]  }
   0x6   :  { %195 = vmatprep.mubr.bf16.mxu0 %v293_v11  ;;  %v288_v14 = vld [vmem:[%s377_s1 + $0x30] sm:$0xff]   ;;  %v290_v16 = vld [vmem:[%s377_s1 + $0x38] sm:$0xff]   ;;  %v291_v17 = vld [vmem:[%s378_s0] ss:$8 sps:$4 sm:$0xff]  }
   0x7   :  { %256 = vmatpush3.bf16.msra.mxu0 %v278_v3  ;;  %v252_v20 = vld [vmem:[%s379_s2] ss:$0 sm:$0xff] }
   0x8   :  { %257 = vmatprep.subr.bf16.mxu0 %v279_v4 }
   0xb   :  { %258 = vmatpush3.bf16.msra.mxu0 %v280_v5 }
   0xc   :  { %259 = vmatprep.subr.bf16.mxu0 %v281_v6 }
   0xf   :  { %260 = vmatpush3.bf16.msra.mxu0 %v282_v7 }
  0x10   :  { %261 = vmatprep.subr.bf16.mxu0 %v283_v8 }
  0x13   :  { %262 = vmatpush3.bf16.msra.mxu0 %v284_v9 }
  0x14   :  { %263 = vmatprep.subr.bf16.mxu0 %v285_v10 }
  0x17   :  { %264 = vmatpush3.bf16.msra.mxu0 %v286_v12 }
  0x18   :  { %265 = vmatprep.subr.bf16.mxu0 %v287_v13 }
  0x1b   :  { %266 = vmatpush3.bf16.msra.mxu0 %v288_v14 }
  0x1c   :  { %267 = vmatprep.subr.bf16.mxu0 %v289_v15 }
  0x1f   :  { %268 = vmatpush3.bf16.msra.mxu0 %v290_v16 }
  0x22   :  { %196 = vmatmul.mubr.bf16.vlgmr.msra.gmra.mrb[0].mxu0 %v291_v17 }
  0xf5   :  { %v269_v18 = vpop.f32.mrb[0].mxu0 }
  0xf6   :  { %v270_v19 = vpop.f32.mrb[1].mxu0 }
  0xf7   :  { %v271_v21 = vadd.f32 %v270_v19, %v269_v18  ;;  %v272_v22 = vpop.f32.mrb[2].mxu0 }
  0xf8   :  { %v273_v23 = vpop.f32.mrb[3].mxu0 }
  0xf9   :  { %v220_v24 = vadd.f32 %v271_v21, %v252_v20  ;;  %v274_v25 = vadd.f32 %v273_v23, %v272_v22 }
  0xfb   :  { %vm222_vm0 = vcmp.ge.f32.partialorder %v220_v24, 0.0  ;;  %v224_v26 = vmul.f32 0.2, %v220_v24  ;;  %v221_v27 = vadd.f32 %v274_v25, %v252_v20 }
  0xfd   :  { %v226_v28 = vsel %vm222_vm0, %v220_v24, %v224_v26  ;;  %vm223_vm1 = vcmp.ge.f32.partialorder %v221_v27, 0.0  ;;  %v225_v29 = vmul.f32 0.2, %v221_v27 }
  0xfe   :  { %228 = vst [vmem:[%s380_s3] sm:$0xff] %v226_v28 }
  0xff   :  { %v227_v30 = vsel %vm223_vm1, %v221_v27, %v225_v29 }
 0x100   :  { %229 = vst [vmem:[%s380_s3 + $0x8] sm:$0xff] %v227_v30 }

// kernel: gan_loss_forward.14
= control target key start
LH: loop header
LB: loop body
LE: loop exit
PB: predicated region body
PF: predicated region fallthrough
CT: control target
= control target key end

     0   :  { %v216_v0 = vmov 0.0   ;;  %vm217_vm0 = vmmov 0   ;;  %s274_s1 = inlined_call_operand.vmem [shape: bf16[128,128], index: 1, kind: input, shape index: {}]   ;;  %s275_s0 = inlined_call_operand.vmem [shape: bf16[16,128], index: 0, kind: input, shape index: {}]   ;;  %s276_s2 = inlined_call_operand.vmem [shape: f32[1,128], index: 2, kind: input, shape index: {}]   ;;  %s277_s3 = inlined_call_operand.vmem [shape: f32[16,128], index: 3, kind: output, shape index: {}]  }
   0x1   :  { %185 = vmatprep.subr.bf16.mxu0 %v216_v0  ;;  %v207_v1 = vld [vmem:[%s274_s1] sm:$0xff]   ;;  %201 = vmatprep.mubr.msk.bf16.mxu0 %vm217_vm0, %v216_v0  ;;  %v208_v2 = vld [vmem:[%s274_s1 + $0x8] sm:$0xff]   ;;  %v209_v3 = vld [vmem:[%s274_s1 + $0x10] sm:$0xff]  }
   0x2   :  { %186 = vmatpush3.bf16.msra.mxu0 %v207_v1  ;;  %v210_v4 = vld [vmem:[%s274_s1 + $0x18] sm:$0xff]   ;;  %v211_v5 = vld [vmem:[%s274_s1 + $0x20] sm:$0xff]   ;;  %v212_v6 = vld [vmem:[%s274_s1 + $0x28] sm:$0xff]  }
   0x3   :  { %187 = vmatprep.subr.bf16.mxu0 %v216_v0  ;;  %v213_v7 = vld [vmem:[%s274_s1 + $0x30] sm:$0xff]   ;;  %v214_v8 = vld [vmem:[%s274_s1 + $0x38] sm:$0xff]   ;;  %v215_v9 = vld [vmem:[%s275_s0] sm:$0xff]  }
   0x4   :  { %v175_v10 = vld [vmem:[%s276_s2] ss:$0 sm:$0xff] }
   0x6   :  { %188 = vmatpush3.bf16.msra.mxu0 %v208_v2 }
   0x7   :  { %189 = vmatprep.subr.bf16.mxu0 %v216_v0 }
   0xa   :  { %190 = vmatpush3.bf16.msra.mxu0 %v209_v3 }
   0xb   :  { %191 = vmatprep.subr.bf16.mxu0 %v216_v0 }
   0xe   :  { %192 = vmatpush3.bf16.msra.mxu0 %v210_v4 }
   0xf   :  { %193 = vmatprep.subr.bf16.mxu0 %v216_v0 }
  0x12   :  { %194 = vmatpush3.bf16.msra.mxu0 %v211_v5 }
  0x13   :  { %195 = vmatprep.subr.bf16.mxu0 %v216_v0 }
  0x16   :  { %196 = vmatpush3.bf16.msra.mxu0 %v212_v6 }
  0x17   :  { %197 = vmatprep.subr.bf16.mxu0 %v216_v0 }
  0x1a   :  { %198 = vmatpush3.bf16.msra.mxu0 %v213_v7 }
  0x1b   :  { %199 = vmatprep.subr.bf16.mxu0 %v216_v0 }
  0x1e   :  { %200 = vmatpush3.bf16.msra.mxu0 %v214_v8 }
  0x21   :  { %202 = vmatmul.mubr.bf16.vlgmr.msra.gmra.mrb[0].mxu0 %v215_v9 }
  0xf4   :  { %v129_v11 = vpop.f32.mrb[0].mxu0 }
  0xf5   :  { %v152_v12 = vadd.f32 %v175_v10, %v129_v11  ;;  %v203_v13 = vpop.f32.mrb[1].mxu0 }
  0xf6   :  { %v132_v14 = vpop.f32.mrb[2].mxu0 }
  0xf7   :  { %vm154_vm1 = vcmp.ge.f32.partialorder %v152_v12, 0.0  ;;  %v156_v15 = vmul.f32 0.2, %v152_v12  ;;  %v153_v16 = vadd.f32 %v175_v10, %v132_v14  ;;  %v204_v17 = vpop.f32.mrb[3].mxu0 }
  0xf9   :  { %v158_v18 = vsel %vm154_vm1, %v152_v12, %v156_v15  ;;  %vm155_vm2 = vcmp.ge.f32.partialorder %v153_v16, 0.0  ;;  %v157_v19 = vmul.f32 0.2, %v153_v16 }
  0xfa   :  { %160 = vst [vmem:[%s277_s3] sm:$0xff] %v158_v18 }
  0xfb   :  { %v159_v20 = vsel %vm155_vm2, %v153_v16, %v157_v19 }
  0xfc   :  { %161 = vst [vmem:[%s277_s3 + $0x8] sm:$0xff] %v159_v20 }

// kernel: gan_loss_forward.15
= control target key start
LH: loop header
LB: loop body
LE: loop exit
PB: predicated region body
PF: predicated region fallthrough
CT: control target
= control target key end

     0   :  { %s355_s1 = inlined_call_operand.vmem [shape: bf16[256,128], index: 1, kind: input, shape index: {}]   ;;  %s356_s0 = inlined_call_operand.vmem [shape: bf16[8,256], index: 0, kind: input, shape index: {}]   ;;  %s357_s2 = inlined_call_operand.vmem [shape: f32[1,128], index: 2, kind: input, shape index: {}]   ;;  %s358_s3 = inlined_call_operand.vmem [shape: f32[8,128], index: 3, kind: output, shape index: {}]  }
   0x1   :  { %v260_v0 = vld [vmem:[%s355_s1 + $0x40] sm:$0xff]   ;;  %v262_v2 = vld [vmem:[%s355_s1 + $0x48] sm:$0xff]   ;;  %v264_v4 = vld [vmem:[%s355_s1 + $0x50] sm:$0xff]  }
   0x2   :  { %v261_v1 = vld [vmem:[%s355_s1] sm:$0xff]   ;;  %238 = vmatprep.subr.bf16.mxu0 %v260_v0  ;;  %v263_v3 = vld [vmem:[%s355_s1 + $0x8] sm:$0xff]   ;;  %v265_v5 = vld [vmem:[%s355_s1 + $0x10] sm:$0xff]  }
   0x3   :  { %239 = vmatpush3.bf16.msra.mxu0 %v261_v1  ;;  %v266_v6 = vld [vmem:[%s355_s1 + $0x58] sm:$0xff]   ;;  %v268_v8 = vld [vmem:[%s355_s1 + $0x60] sm:$0xff]   ;;  %v270_v10 = vld [vmem:[%s355_s1 + $0x68] sm:$0xff]  }
   0x4   :  { %240 = vmatprep.subr.bf16.mxu0 %v262_v2  ;;  %v267_v7 = vld [vmem:[%s355_s1 + $0x18] sm:$0xff]   ;;  %v269_v9 = vld [vmem:[%s355_s1 + $0x20] sm:$0xff]   ;;  %v271_v13 = vld [vmem:[%s355_s1 + $0x28] sm:$0xff]  }
   0x5   :  { %v21_v11 = vld [vmem:[%s356_s0] sm:$0xff]  ;;  %v272_v14 = vld [vmem:[%s355_s1 + $0x70] sm:$0xff]   ;;  %v274_v16 = vld [vmem:[%s355_s1 + $0x78] sm:$0xff]  }
   0x6   :  { %v220_v12 = vcombine.high %v21_v11, %v21_v11  ;;  %v273_v15 = vld [vmem:[%s355_s1 + $0x30] sm:$0xff]   ;;  %v275_v17 = vld [vmem:[%s355_s1 + $0x38] sm:$0xff]   ;;  %v219_v18 = vcombine.low %v21_v11, %v21_v11  ;;  %v237_v21 = vld [vmem:[%s357_s2] ss:$0 sm:$0xff] }
   0x7   :  { %241 = vmatpush3.bf16.msra.mxu0 %v263_v3 }
   0x8   :  { %242 = vmatprep.subr.bf16.mxu0 %v264_v4  ;;  %189 = vmatprep.mubr.bf16.mxu0 %v220_v12 }
   0xb   :  { %243 = vmatpush3.bf16.msra.mxu0 %v265_v5 }
   0xc   :  { %244 = vmatprep.subr.bf16.mxu0 %v266_v6 }
   0xf   :  { %245 = vmatpush3.bf16.msra.mxu0 %v267_v7 }
  0x10   :  { %246 = vmatprep.subr.bf16.mxu0 %v268_v8 }
  0x13   :  { %247 = vmatpush3.bf16.msra.mxu0 %v269_v9 }
  0x14   :  { %248 = vmatprep.subr.bf16.mxu0 %v270_v10 }
  0x17   :  { %249 = vmatpush3.bf16.msra.mxu0 %v271_v13 }
  0x18   :  { %250 = vmatprep.subr.bf16.mxu0 %v272_v14 }
  0x1b   :  { %251 = vmatpush3.bf16.msra.mxu0 %v273_v15 }
  0x1c   :  { %252 = vmatprep.subr.bf16.mxu0 %v274_v16 }
  0x1f   :  { %253 = vmatpush3.bf16.msra.mxu0 %v275_v17 }
  0x22   :  { %190 = vmatmul.mubr.bf16.vlgmr.msra.gmra.mrb[0].mxu0 %v219_v18 }
  0xf5   :  { %v254_v19 = vpop.f32.mrb[0].mxu0 }
  0xf6   :  { %v255_v20 = vpop.f32.mrb[1].mxu0 }
  0xf7   :  { %v256_v22 = vadd.f32 %v255_v20, %v254_v19  ;;  %v257_v23 = vpop.f32.mrb[2].mxu0 }
  0xf8   :  { %v258_v24 = vpop.f32.mrb[3].mxu0 }
  0xf9   :  { %v210_v25 = vadd.f32 %v256_v22, %v237_v21 }
  0xfb   :  { %vm211_vm0 = vcmp.ge.f32.partialorder %v210_v25, 0.0  ;;  %v212_v26 = vmul.f32 0.2, %v210_v25 }
  0xfd   :  { %v213_v27 = vsel %vm211_vm0, %v210_v25, %v212_v26 }
  0xfe   :  { %214 = vst [vmem:[%s358_s3] sm:$0xff] %v213_v27 }

// kernel: gan_loss_forward.17
= control target key start
LH: loop header
LB: loop body
LE: loop exit
PB: predicated region body
PF: predicated region fallthrough
CT: control target
= control target key end

     0   :  { %s148_s0 = inlined_call_operand.vmem [shape: f32[24,128], index: 0, kind: input, shape index: {}]   ;;  %s149_s1 = inlined_call_operand.vmem [shape: f32[24,128], index: 1, kind: input, shape index: {}]   ;;  %s150_s2 = inlined_call_operand.vmem [shape: f32[24,128], index: 2, kind: input, shape index: {}]   ;;  %s151_s3 = inlined_call_operand.hbm [shape: f32[1,1], index: 3, kind: output, shape index: {}]  }
   0x1   :  { %v25_v0 = vld [vmem:[%s148_s0] sm:$0xff]  ;;  %v26_v1 = vld [vmem:[%s148_s0 + $0x8] sm:$0xff]  ;;  %v27_v2 = vld [vmem:[%s148_s0 + $0x10] sm:$0xff] }
   0x2   :  { %v28_v3 = vld [vmem:[%s149_s1] sm:$0xff]  ;;  %v29_v4 = vld [vmem:[%s149_s1 + $0x8] sm:$0xff]  ;;  %v30_v5 = vld [vmem:[%s149_s1 + $0x10] sm:$0xff] }
   0x3   :  { %v31_v6 = vsub.f32 %v25_v0, %v28_v3  ;;  %v32_v7 = vsub.f32 %v26_v1, %v29_v4  ;;  %v33_v8 = vsub.f32 %v27_v2, %v30_v5 }
   0x4   :  { %8 = vsyncpa [#allocation4], 0  ;;  %v22_v9 = vld [vmem:[%s150_s2] sm:$0xff]  ;;  %v23_v10 = vld [vmem:[%s150_s2 + $0x8] sm:$0xff]  ;;  %s76_s30 = scalar_lea.hbm %s151_s3, 16 }
   0x5   :  { %v24_v11 = vld [vmem:[%s150_s2 + $0x10] sm:$0xff]  ;;  %v34_v12 = vand.u32 2147483647, %v31_v6  ;;  %v35_v13 = vand.u32 2147483647, %v32_v7  ;;  %p77_p0 = scmp.ne.s32.totalorder %s151_s3, %s76_s30  ;;  %p80_p1 = scmp.lt.u32.totalorder %s76_s30, %s151_s3 }
   0x6   :  { %v36_v14 = vand.u32 2147483647, %v33_v8 }
   0x7   :  { %v37_v15 = vmul.f32 %v34_v12, %v22_v9  ;;  %v38_v16 = vmul.f32 %v35_v13, %v23_v10  ;;  %p82_p2 = pnand %p80_p1, %p77_p0 }
   0x8   :  { %v39_v17 = vmul.f32 %v36_v14, %v24_v11 }
   0x9   :  { %v40_v18 = vadd.f32 %v38_v16, %v37_v15 }
   0xb   :  { %v41_v19 = vadd.f32 %v40_v18, %v39_v17 }
   0xd   :  { %42 = vadd.xlane.f32.xlu0 %v41_v19 }
  0x9a   :  { %v43_v20 = vpop.xlane.xlu0 %42 }
  0x9b   :  { %v44_v21 = vrot.slane %v43_v20, 4 }
  0x9d   :  { %v45_v22 = vadd.f32 %v44_v21, %v43_v20 }
  0x9f   :  { %v46_v23 = vrot.slane %v45_v22, 2 }
  0xa1   :  { %v47_v24 = vadd.f32 %v46_v23, %v45_v22 }
  0xa3   :  { %v48_v25 = vrot.slane %v47_v24, 1 }
  0xa5   :  { %v49_v26 = vadd.f32 %v48_v25, %v47_v24 }
  0xa7   :  { %73 = vpush %v49_v26 }
  0xd8   :  { %s74_s1 = spop %73 }
  0xd9   :  { %59 = sst [smem:[#allocation3]] %s74_s1 }
  0xda   :  { %85 = shalt.err (!%p82_p2)
}
  0xdb   :  { %s88_s8 = smov [#allocation3]  }
  0xdc   :  { %67 = dma.smem_to_hbm %s88_s8, 16, %s151_s3, [#allocation4]  }
  0xdd   :  { %86 = dma.done.wait [#allocation4], 16  }
  0xde   :  { %87 = vsyncadd [#allocation4], 4294967280 }
  0xdf   :  { %71 = sfence }
  0xe0   :  { %72 = vsyncpa [#allocation4], 1 }

// kernel: gan_loss_forward.16
= control target key start
LH: loop header
LB: loop body
LE: loop exit
PB: predicated region body
PF: predicated region fallthrough
CT: control target
= control target key end

     0   :  { %10 = vsyncpa [#allocation5], 0  ;;  %v552_v1 = vmov 0.0   ;;  %vm553_vm0 = vmmov 0   ;;  %s686_s0 = inlined_call_operand.vmem [shape: bf16[8,384], index: 0, kind: input, shape index: {}]   ;;  %s687_s1 = inlined_call_operand.vmem [shape: bf16[384,128], index: 1, kind: input, shape index: {}]   ;;  %s688_s2 = inlined_call_operand.vmem [shape: f32[1,128], index: 2, kind: input, shape index: {}]   ;;  %s689_s3 = inlined_call_operand.hbm [shape: f32[1,1], index: 3, kind: output, shape index: {0}]   ;;  %s690_s4 = inlined_call_operand.hbm [shape: f32[1,1], index: 4, kind: output, shape index: {1}]  }
   0x1   :  { %v501_v0 = vld [vmem:[%s687_s1 + $0x40] sm:$0xff]   ;;  %473 = vmatprep.subr.bf16.mxu1 %v552_v1  ;;  %489 = vmatprep.mubr.msk.bf16.mxu1 %vm553_vm0, %v552_v1  ;;  %v504_v4 = vld [vmem:[%s687_s1 + $0x48] sm:$0xff]   ;;  %v507_v7 = vld [vmem:[%s687_s1 + $0x50] sm:$0xff]  }
   0x2   :  { %v502_v2 = vld [vmem:[%s687_s1] sm:$0xff]   ;;  %442 = vmatprep.subr.bf16.mxu0 %v501_v0  ;;  %v505_v5 = vld [vmem:[%s687_s1 + $0x8] sm:$0xff]   ;;  %v508_v8 = vld [vmem:[%s687_s1 + $0x10] sm:$0xff]  }
   0x3   :  { %v503_v3 = vld [vmem:[%s687_s1 + $0x80] sm:$0xff]   ;;  %443 = vmatpush3.bf16.msra.mxu0 %v502_v2  ;;  %v506_v6 = vld [vmem:[%s687_s1 + $0x88] sm:$0xff]   ;;  %v509_v9 = vld [vmem:[%s687_s1 + $0x90] sm:$0xff]  }
   0x4   :  { %474 = vmatpush3.bf16.msra.mxu1 %v503_v3  ;;  %444 = vmatprep.subr.bf16.mxu0 %v504_v4  ;;  %v510_v10 = vld [vmem:[%s687_s1 + $0x58] sm:$0xff]   ;;  %v513_v13 = vld [vmem:[%s687_s1 + $0x60] sm:$0xff]   ;;  %v516_v16 = vld [vmem:[%s687_s1 + $0x68] sm:$0xff]  }
   0x5   :  { %475 = vmatprep.subr.bf16.mxu1 %v552_v1  ;;  %v511_v11 = vld [vmem:[%s687_s1 + $0x18] sm:$0xff]   ;;  %v514_v14 = vld [vmem:[%s687_s1 + $0x20] sm:$0xff]   ;;  %v517_v17 = vld [vmem:[%s687_s1 + $0x28] sm:$0xff]  }
   0x6   :  { %v512_v12 = vld [vmem:[%s687_s1 + $0x98] sm:$0xff]   ;;  %v515_v15 = vld [vmem:[%s687_s1 + $0xa0] sm:$0xff]   ;;  %v518_v18 = vld [vmem:[%s687_s1 + $0xa8] sm:$0xff]  }
   0x7   :  { %445 = vmatpush3.bf16.msra.mxu0 %v505_v5  ;;  %v519_v19 = vld [vmem:[%s687_s1 + $0x70] sm:$0xff]   ;;  %v522_v22 = vld [vmem:[%s687_s1 + $0x78] sm:$0xff]   ;;  %v34_v23 = vld [vmem:[%s686_s0] sm:$0xff] }
   0x8   :  { %476 = vmatpush3.bf16.msra.mxu1 %v506_v6  ;;  %446 = vmatprep.subr.bf16.mxu0 %v507_v7  ;;  %v520_v20 = vld [vmem:[%s687_s1 + $0x30] sm:$0xff]   ;;  %v413_v24 = vcombine.high %v34_v23, %v34_v23 }
   0x9   :  { %477 = vmatprep.subr.bf16.mxu1 %v552_v1  ;;  %v521_v21 = vld [vmem:[%s687_s1 + $0xb0] sm:$0xff]  }
   0xb   :  { %447 = vmatpush3.bf16.msra.mxu0 %v508_v8 }
   0xc   :  { %478 = vmatpush3.bf16.msra.mxu1 %v509_v9  ;;  %448 = vmatprep.subr.bf16.mxu0 %v510_v10 }
   0xd   :  { %479 = vmatprep.subr.bf16.mxu1 %v552_v1 }
   0xf   :  { %449 = vmatpush3.bf16.msra.mxu0 %v511_v11 }
  0x10   :  { %480 = vmatpush3.bf16.msra.mxu1 %v512_v12  ;;  %450 = vmatprep.subr.bf16.mxu0 %v513_v13 }
  0x11   :  { %481 = vmatprep.subr.bf16.mxu1 %v552_v1 }
  0x13   :  { %451 = vmatpush3.bf16.msra.mxu0 %v514_v14 }
  0x14   :  { %482 = vmatpush3.bf16.msra.mxu1 %v515_v15  ;;  %452 = vmatprep.subr.bf16.mxu0 %v516_v16 }
  0x15   :  { %483 = vmatprep.subr.bf16.mxu1 %v552_v1 }
  0x17   :  { %453 = vmatpush3.bf16.msra.mxu0 %v517_v17 }
  0x18   :  { %484 = vmatpush3.bf16.msra.mxu1 %v518_v18  ;;  %454 = vmatprep.subr.bf16.mxu0 %v519_v19 }
  0x19   :  { %485 = vmatprep.subr.bf16.mxu1 %v552_v1 }
  0x1a   :  { %11 = vsyncpa [#allocation7], 0  ;;  %v523_v25 = vld [vmem:[%s687_s1 + $0x38] sm:$0xff]   ;;  %271 = vmatprep.mubr.bf16.mxu0 %v413_v24  ;;  %v412_v27 = vcombine.low %v34_v23, %v34_v23  ;;  %v527_v28 = vld [vmem:[%s686_s0 + $0x8] ss:$0 sps:$4 sm:$0xff]   ;;  %v333_v29 = vlaneseq  ;;  %s528_s17 = scalar_lea.hbm %s689_s3, 16 }
  0x1b   :  { %455 = vmatpush3.bf16.msra.mxu0 %v520_v20  ;;  %v524_v26 = vld [vmem:[%s687_s1 + $0xb8] sm:$0xff]   ;;  %v439_v40 = vld [vmem:[%s688_s2] ss:$0 sm:$0xff]  ;;  %p529_p0 = scmp.ne.s32.totalorder %s689_s3, %s528_s17  ;;  %p532_p1 = scmp.lt.u32.totalorder %s528_s17, %s689_s3 }
  0x1c   :  { %486 = vmatpush3.bf16.msra.mxu1 %v521_v21  ;;  %456 = vmatprep.subr.bf16.mxu0 %v522_v22  ;;  %v334_v36 = vshrl.u32 %v333_v29, 7  ;;  %v339_v37 = vand.u32 127, %v333_v29 }
  0x1d   :  { %487 = vmatprep.subr.bf16.mxu1 %v552_v1  ;;  %p534_p2 = pnand %p532_p1, %p529_p0 }
  0x1e   :  { %vm340_vm1 = vcmp.eq.s32.totalorder %v339_v37, 0  ;;  %vm341_vm2 = vcmp.lt.s32.totalorder %v334_v36, 2  ;;  %vm343_vm3 = vcmp.ge.s32.totalorder %v334_v36, 2  ;;  %vm344_vm4 = vcmp.lt.s32.totalorder %v334_v36, 4 }
  0x1f   :  { %457 = vmatpush3.bf16.msra.mxu0 %v523_v25  ;;  %vm342_vm5 = vmand %vm340_vm1, %vm341_vm2 }
  0x20   :  { %488 = vmatpush3.bf16.msra.mxu1 %v524_v26  ;;  %vm345_vm6 = vmand %vm343_vm3, %vm344_vm4 }
  0x21   :  { %vm346_vm7 = vmand %vm340_vm1, %vm345_vm6 }
  0x22   :  { %272 = vmatmul.mubr.bf16.vlgmr.msra.gmra.mrb[0].mxu0 %v412_v27 }
  0x23   :  { %490 = vmatmul.mubr.bf16.vlgmr.msra.gmra.mrb[0].mxu1 %v527_v28 }
  0xf5   :  { %v458_v30 = vpop.f32.mrb[0].mxu0 }
  0xf6   :  { %v313_v31 = vpop.f32.mrb[0].mxu1  ;;  %v459_v32 = vpop.f32.mrb[1].mxu0 }
  0xf7   :  { %v460_v33 = vadd.f32 %v459_v32, %v458_v30  ;;  %v491_v34 = vpop.f32.mrb[1].mxu1  ;;  %v461_v35 = vpop.f32.mrb[2].mxu0 }
  0xf8   :  { %v316_v38 = vpop.f32.mrb[2].mxu1  ;;  %v462_v39 = vpop.f32.mrb[3].mxu0 }
  0xf9   :  { %v314_v41 = vadd.f32 %v460_v33, %v313_v31  ;;  %v492_v42 = vpop.f32.mrb[3].mxu1 }
  0xfb   :  { %v332_v43 = vadd.f32 %v439_v40, %v314_v41 }
  0xfd   :  { %v348_v44 = vsub.f32 1.0, %v332_v43  ;;  %v364_v45 = vadd.f32 1.0, %v332_v43 }
  0xff   :  { %v349_v46 = vmax.f32 %v348_v44, 0.0  ;;  %v365_v48 = vmax.f32 %v364_v45, 0.0 }
 0x101   :  { %v350_v47 = vsel %vm342_vm5, %v349_v46, 0.0  ;;  %v366_v49 = vsel %vm346_vm7, %v365_v48, 0.0 }
 0x102   :  { %351 = vadd.xlane.f32.xlu0 %v350_v47 }
 0x106   :  { %367 = vadd.xlane.f32.xlu0 %v366_v49 }
 0x18f   :  { %v352_v50 = vpop.xlane.xlu0 %351 }
 0x190   :  { %v353_v51 = vrot.slane %v352_v50, 4 }
 0x192   :  { %v354_v52 = vadd.f32 %v353_v51, %v352_v50 }
 0x193   :  { %v368_v53 = vpop.xlane.xlu0 %367 }
 0x194   :  { %v355_v54 = vrot.slane %v354_v52, 2  ;;  %v369_v55 = vrot.slane %v368_v53, 4 }
 0x196   :  { %v370_v56 = vadd.f32 %v369_v55, %v368_v53  ;;  %v356_v57 = vadd.f32 %v355_v54, %v354_v52 }
 0x198   :  { %v371_v58 = vrot.slane %v370_v56, 2  ;;  %v357_v59 = vrot.slane %v356_v57, 1 }
 0x19a   :  { %v372_v60 = vadd.f32 %v371_v58, %v370_v56  ;;  %v358_v61 = vadd.f32 %v357_v59, %v356_v57 }
 0x19c   :  { %493 = vpush %v358_v61  ;;  %v373_v62 = vrot.slane %v372_v60, 1 }
 0x19e   :  { %v374_v63 = vadd.f32 %v373_v62, %v372_v60 }
 0x1a0   :  { %495 = vpush %v374_v63 }
 0x1cd   :  { %s494_s0 = spop %493 }
 0x1ce   :  { %383 = sst [smem:[#allocation4]] %s494_s0 }
 0x1cf   :  { %537 = shalt.err (!%p534_p2)
}
 0x1d0   :  { %s554_s22 = smov [#allocation4]   ;;  %s538_s28 = scalar_lea.hbm %s690_s4, 16 }
 0x1d1   :  { %394 = dma.smem_to_hbm %s554_s22, 16, %s689_s3, [#allocation5]  }
 0x1d2   :  { %s496_s25 = spop %495  ;;  %p539_p3 = scmp.ne.s32.totalorder %s690_s4, %s538_s28 }
 0x1d3   :  { %386 = sst [smem:[#allocation6]] %s496_s25  ;;  %p542_p4 = scmp.lt.u32.totalorder %s538_s28, %s690_s4 }
 0x1d5   :  { %p544_p5 = pnand %p542_p4, %p539_p3 }
 0x1d7   :  { %547 = shalt.err (!%p544_p5)
}
 0x1d8   :  { %s555_s7 = smov [#allocation6]  }
 0x1d9   :  { %402 = dma.smem_to_hbm %s555_s7, 16, %s690_s4, [#allocation7]  }
 0x1da   :  { %548 = dma.done.wait [#allocation5], 16  }
 0x1db   :  { %549 = vsyncadd [#allocation5], 4294967280 }
 0x1dc   :  { %550 = dma.done.wait [#allocation7], 16  }
 0x1dd   :  { %551 = vsyncadd [#allocation7], 4294967280 }
 0x1de   :  { %409 = sfence }
 0x1df   :  { %410 = vsyncpa [#allocation5], 1 }
 0x1e0   :  { %411 = vsyncpa [#allocation7], 1 }

// kernel: gan_loss_forward.12
= control target key start
LH: loop header
LB: loop body
LE: loop exit
PB: predicated region body
PF: predicated region fallthrough
CT: control target
= control target key end

     0   :  { %10 = vsyncpa [#allocation5], 0  ;;  %v584_v1 = vmov 0.0   ;;  %vm585_vm0 = vmmov 0   ;;  %s721_s0 = inlined_call_operand.vmem [shape: bf16[16,384], index: 0, kind: input, shape index: {}]   ;;  %s722_s1 = inlined_call_operand.vmem [shape: bf16[384,128], index: 1, kind: input, shape index: {}]   ;;  %s723_s2 = inlined_call_operand.vmem [shape: f32[1,128], index: 2, kind: input, shape index: {}]   ;;  %s724_s3 = inlined_call_operand.hbm [shape: f32[1,1], index: 3, kind: output, shape index: {0}]   ;;  %s725_s4 = inlined_call_operand.hbm [shape: f32[1,1], index: 4, kind: output, shape index: {1}]  }
   0x1   :  { %v532_v0 = vld [vmem:[%s722_s1 + $0x40] sm:$0xff]   ;;  %504 = vmatprep.subr.bf16.mxu1 %v584_v1  ;;  %520 = vmatprep.mubr.msk.bf16.mxu1 %vm585_vm0, %v584_v1  ;;  %v535_v4 = vld [vmem:[%s722_s1 + $0x48] sm:$0xff]   ;;  %v538_v7 = vld [vmem:[%s722_s1 + $0x50] sm:$0xff]  }
   0x2   :  { %v533_v2 = vld [vmem:[%s722_s1] sm:$0xff]   ;;  %473 = vmatprep.subr.bf16.mxu0 %v532_v0  ;;  %v536_v5 = vld [vmem:[%s722_s1 + $0x8] sm:$0xff]   ;;  %v539_v8 = vld [vmem:[%s722_s1 + $0x10] sm:$0xff]  }
   0x3   :  { %v534_v3 = vld [vmem:[%s722_s1 + $0x80] sm:$0xff]   ;;  %474 = vmatpush3.bf16.msra.mxu0 %v533_v2  ;;  %v537_v6 = vld [vmem:[%s722_s1 + $0x88] sm:$0xff]   ;;  %v540_v9 = vld [vmem:[%s722_s1 + $0x90] sm:$0xff]  }
   0x4   :  { %505 = vmatpush3.bf16.msra.mxu1 %v534_v3  ;;  %475 = vmatprep.subr.bf16.mxu0 %v535_v4  ;;  %v541_v10 = vld [vmem:[%s722_s1 + $0x58] sm:$0xff]   ;;  %v544_v13 = vld [vmem:[%s722_s1 + $0x60] sm:$0xff]   ;;  %v547_v16 = vld [vmem:[%s722_s1 + $0x68] sm:$0xff]  }
   0x5   :  { %506 = vmatprep.subr.bf16.mxu1 %v584_v1  ;;  %v542_v11 = vld [vmem:[%s722_s1 + $0x18] sm:$0xff]   ;;  %v545_v14 = vld [vmem:[%s722_s1 + $0x20] sm:$0xff]   ;;  %v548_v17 = vld [vmem:[%s722_s1 + $0x28] sm:$0xff]  }
   0x6   :  { %v543_v12 = vld [vmem:[%s722_s1 + $0x98] sm:$0xff]   ;;  %v546_v15 = vld [vmem:[%s722_s1 + $0xa0] sm:$0xff]   ;;  %v549_v18 = vld [vmem:[%s722_s1 + $0xa8] sm:$0xff]  }
   0x7   :  { %476 = vmatpush3.bf16.msra.mxu0 %v536_v5  ;;  %v550_v19 = vld [vmem:[%s722_s1 + $0x70] sm:$0xff]   ;;  %v553_v22 = vld [vmem:[%s722_s1 + $0x78] sm:$0xff]  }
   0x8   :  { %507 = vmatpush3.bf16.msra.mxu1 %v537_v6  ;;  %477 = vmatprep.subr.bf16.mxu0 %v538_v7  ;;  %v551_v20 = vld [vmem:[%s722_s1 + $0x30] sm:$0xff]  }
   0x9   :  { %508 = vmatprep.subr.bf16.mxu1 %v584_v1  ;;  %v552_v21 = vld [vmem:[%s722_s1 + $0xb0] sm:$0xff]  }
   0xa   :  { %v558_v23 = vld [vmem:[%s721_s0 + $0x4] ss:$12 sps:$4 sm:$0xff]  }
   0xb   :  { %478 = vmatpush3.bf16.msra.mxu0 %v539_v8 }
   0xc   :  { %509 = vmatpush3.bf16.msra.mxu1 %v540_v9  ;;  %479 = vmatprep.subr.bf16.mxu0 %v541_v10 }
   0xd   :  { %510 = vmatprep.subr.bf16.mxu1 %v584_v1 }
   0xf   :  { %480 = vmatpush3.bf16.msra.mxu0 %v542_v11 }
  0x10   :  { %511 = vmatpush3.bf16.msra.mxu1 %v543_v12  ;;  %481 = vmatprep.subr.bf16.mxu0 %v544_v13 }
  0x11   :  { %512 = vmatprep.subr.bf16.mxu1 %v584_v1 }
  0x13   :  { %482 = vmatpush3.bf16.msra.mxu0 %v545_v14 }
  0x14   :  { %513 = vmatpush3.bf16.msra.mxu1 %v546_v15  ;;  %483 = vmatprep.subr.bf16.mxu0 %v547_v16 }
  0x15   :  { %514 = vmatprep.subr.bf16.mxu1 %v584_v1 }
  0x17   :  { %484 = vmatpush3.bf16.msra.mxu0 %v548_v17 }
  0x18   :  { %515 = vmatpush3.bf16.msra.mxu1 %v549_v18  ;;  %485 = vmatprep.subr.bf16.mxu0 %v550_v19 }
  0x19   :  { %516 = vmatprep.subr.bf16.mxu1 %v584_v1 }
  0x1a   :  { %11 = vsyncpa [#allocation7], 0  ;;  %v554_v24 = vld [vmem:[%s722_s1 + $0x38] sm:$0xff]   ;;  %280 = vmatprep.mubr.bf16.mxu0 %v558_v23  ;;  %v556_v26 = vld [vmem:[%s721_s0] ss:$12 sps:$4 sm:$0xff]   ;;  %v355_v31 = vlaneseq  ;;  %s560_s19 = scalar_lea.hbm %s724_s3, 16 }
  0x1b   :  { %486 = vmatpush3.bf16.msra.mxu0 %v551_v20  ;;  %v555_v25 = vld [vmem:[%s722_s1 + $0xb8] sm:$0xff]   ;;  %v559_v27 = vld [vmem:[%s721_s0 + $0x8] ss:$12 sps:$4 sm:$0xff]   ;;  %v470_v37 = vld [vmem:[%s723_s2] ss:$0 sm:$0xff]  ;;  %p561_p0 = scmp.ne.s32.totalorder %s724_s3, %s560_s19  ;;  %p564_p1 = scmp.lt.u32.totalorder %s560_s19, %s724_s3 }
  0x1c   :  { %517 = vmatpush3.bf16.msra.mxu1 %v552_v21  ;;  %487 = vmatprep.subr.bf16.mxu0 %v553_v22  ;;  %v356_v41 = vand.u32 127, %v355_v31 }
  0x1d   :  { %518 = vmatprep.subr.bf16.mxu1 %v584_v1  ;;  %p566_p2 = pnand %p564_p1, %p561_p0 }
  0x1e   :  { %vm357_vm1 = vcmp.eq.s32.totalorder %v356_v41, 0 }
  0x1f   :  { %488 = vmatpush3.bf16.msra.mxu0 %v554_v24 }
  0x20   :  { %519 = vmatpush3.bf16.msra.mxu1 %v555_v25 }
  0x22   :  { %281 = vmatmul.mubr.bf16.vlgmr.msra.gmra.mrb[0].mxu0 %v556_v26 }
  0x23   :  { %521 = vmatmul.mubr.bf16.vlgmr.msra.gmra.mrb[0].mxu1 %v559_v27 }
  0xf5   :  { %v489_v28 = vpop.f32.mrb[0].mxu0 }
  0xf6   :  { %v323_v29 = vpop.f32.mrb[0].mxu1  ;;  %v490_v30 = vpop.f32.mrb[1].mxu0 }
  0xf7   :  { %v491_v32 = vadd.f32 %v490_v30, %v489_v28  ;;  %v522_v33 = vpop.f32.mrb[1].mxu1  ;;  %v492_v34 = vpop.f32.mrb[2].mxu0 }
  0xf8   :  { %v326_v35 = vpop.f32.mrb[2].mxu1  ;;  %v493_v36 = vpop.f32.mrb[3].mxu0 }
  0xf9   :  { %v324_v38 = vadd.f32 %v491_v32, %v323_v29  ;;  %v494_v39 = vadd.f32 %v493_v36, %v492_v34  ;;  %v523_v40 = vpop.f32.mrb[3].mxu1 }
  0xfb   :  { %v327_v42 = vadd.f32 %v494_v39, %v326_v35  ;;  %v346_v43 = vadd.f32 %v470_v37, %v324_v38 }
  0xfd   :  { %v371_v44 = vsub.f32 1.0, %v346_v43  ;;  %v347_v45 = vadd.f32 %v470_v37, %v327_v42 }
  0xff   :  { %v373_v46 = vmax.f32 %v371_v44, 0.0  ;;  %v392_v47 = vadd.f32 1.0, %v347_v45 }
 0x101   :  { %v375_v48 = vsel %vm357_vm1, %v373_v46, 0.0  ;;  %v394_v49 = vmax.f32 %v392_v47, 0.0 }
 0x102   :  { %378 = vadd.xlane.f32.xlu0 %v375_v48 }
 0x103   :  { %v396_v50 = vsel %vm357_vm1, %v394_v49, 0.0 }
 0x106   :  { %398 = vadd.xlane.f32.xlu0 %v396_v50 }
 0x18f   :  { %v379_v51 = vpop.xlane.xlu0 %378 }
 0x190   :  { %v380_v52 = vrot.slane %v379_v51, 4 }
 0x192   :  { %v381_v53 = vadd.f32 %v380_v52, %v379_v51 }
 0x193   :  { %v399_v54 = vpop.xlane.xlu0 %398 }
 0x194   :  { %v382_v55 = vrot.slane %v381_v53, 2  ;;  %v400_v56 = vrot.slane %v399_v54, 4 }
 0x196   :  { %v401_v57 = vadd.f32 %v400_v56, %v399_v54  ;;  %v383_v58 = vadd.f32 %v382_v55, %v381_v53 }
 0x198   :  { %v402_v59 = vrot.slane %v401_v57, 2  ;;  %v384_v60 = vrot.slane %v383_v58, 1 }
 0x19a   :  { %v403_v61 = vadd.f32 %v402_v59, %v401_v57  ;;  %v385_v62 = vadd.f32 %v384_v60, %v383_v58 }
 0x19c   :  { %524 = vpush %v385_v62  ;;  %v404_v63 = vrot.slane %v403_v61, 1 }
 0x19e   :  { %v405_v0 = vadd.f32 %v404_v63, %v403_v61 }
 0x1a0   :  { %526 = vpush %v405_v0 }
 0x1cd   :  { %s525_s0 = spop %524 }
 0x1ce   :  { %414 = sst [smem:[#allocation4]] %s525_s0 }
 0x1cf   :  { %569 = shalt.err (!%p566_p2)
}
 0x1d0   :  { %s586_s24 = smov [#allocation4]   ;;  %s570_s30 = scalar_lea.hbm %s725_s4, 16 }
 0x1d1   :  { %425 = dma.smem_to_hbm %s586_s24, 16, %s724_s3, [#allocation5]  }
 0x1d2   :  { %s527_s27 = spop %526  ;;  %p571_p3 = scmp.ne.s32.totalorder %s725_s4, %s570_s30 }
 0x1d3   :  { %417 = sst [smem:[#allocation6]] %s527_s27  ;;  %p574_p4 = scmp.lt.u32.totalorder %s570_s30, %s725_s4 }
 0x1d5   :  { %p576_p5 = pnand %p574_p4, %p571_p3 }
 0x1d7   :  { %579 = shalt.err (!%p576_p5)
}
 0x1d8   :  { %s587_s9 = smov [#allocation6]  }
 0x1d9   :  { %433 = dma.smem_to_hbm %s587_s9, 16, %s725_s4, [#allocation7]  }
 0x1da   :  { %580 = dma.done.wait [#allocation5], 16  }
 0x1db   :  { %581 = vsyncadd [#allocation5], 4294967280 }
 0x1dc   :  { %582 = dma.done.wait [#allocation7], 16  }
 0x1dd   :  { %583 = vsyncadd [#allocation7], 4294967280 }
 0x1de   :  { %440 = sfence }
 0x1df   :  { %441 = vsyncpa [#allocation5], 1 }
 0x1e0   :  { %442 = vsyncpa [#allocation7], 1 }

</bundles_post_ra>
